<compile_context>
chip_gen: v7x
topology: tpu7x:2x2x1
jax: 0.10.0
libtpu: 0.0.40
codegen_flags: <defaults>
</compile_context>

<pallas_src>
import jax
import jax.numpy as jnp
from jax.experimental import pallas as pl
from jax.experimental.pallas import tpu as pltpu


def _round_up(v, m):
    return (v + m - 1) // m * m


def _vmem_capacity_bytes():
    """Physical VMEM of the local TPU generation (fallback: 128 MiB)."""
    try:
        cap = int(pltpu.get_tpu_info().vmem_capacity_bytes)
        if cap > 0:
            return cap
    except Exception:
        pass
    return 128 * 1024 * 1024


def _vmem_need_bytes(tm, n_p, f_p, single_buffer):
    nb = 1 if single_buffer else 2
    hw0 = nb * n_p * f_p * 2                        # HW_0 input (constant block index)
    a = (nb if tm == n_p else 2) * tm * n_p * 2     # A: resident (1 buf) or streamed (2)
    w = 2 * f_p * f_p * 2                           # W_{l+1}, double-buffered
    b = 2 * 8 * f_p * 4                             # bias block (sublane-padded) f32
    o = 2 * n_p * f_p * 4                           # resident output block f32
    hw = 2 * n_p * f_p * 2                          # ping-pong H@W scratch bf16
    tmp = 3 * tm * f_p * 4                          # f32 tile temporaries (acc/act/dot)
    return hw0 + a + w + b + o + hw + tmp


def _choose_tm(n_p, f_p, budget, max_tm=None, single_buffer=True):
    """Largest A row tile (divisor of N_p) fitting the generation's VMEM budget.

    Picking the largest fitting tile automatically enforces the >=512 streaming
    floor whenever such a tile fits; TM == N_p keeps A fully resident.
    """
    cands = sorted({t for t in (n_p, 8192, 4096, 2048, 1024, 512, 256, 128)
                    if t <= n_p and n_p % t == 0}, reverse=True)
    if max_tm is not None:
        cands = [t for t in cands if t <= max_tm] or [128]
    fitting = [t for t in cands
               if _vmem_need_bytes(t, n_p, f_p, single_buffer) <= budget]
    if fitting:
        return fitting[0]
    return cands[-1]   # nothing fits the budget: minimize the footprint


def _gcn_fused_kernel(hw0_ref, a_ref, wn_ref, b_ref, o_ref, hw_ref):
    """grid = (num_layers, num_A_row_tiles).

    hw0_ref: (N_p, F_p)     bf16  X @ W_0, resident (constant block index)
    a_ref  : (TM, N_p)      bf16  row tile of A_hat (resident if TM == N_p)
    wn_ref : (1, F_p, F_p)  bf16  W_{l+1} (pre-shifted stack; unused on the last layer)
    b_ref  : (1, 1, F_p)    f32   b_l
    o_ref  : (N_p, F_p)     f32   VMEM-resident output (written on the last layer only)
    hw_ref : (2*N_p, F_p)   bf16  ping-pong H@W buffers (slot l%2 feeds layer l)
    """
    l = pl.program_id(0)
    i = pl.program_id(1)
    n_layers = pl.num_programs(0)
    tm, n_p = a_ref.shape

    # Seed slot 0 with HW_0 once (cheap VMEM->VMEM copy).
    @pl.when(jnp.logical_and(l == 0, i == 0))
    def _():
        hw_ref[pl.ds(0, n_p), :] = hw0_ref[...]

    # Dominant O(N^2) matmul: this layer's aggregation for row tile i.
    cur_off = pl.multiple_of((l % 2) * n_p, 128)
    acc = jnp.dot(a_ref[...], hw_ref[pl.ds(cur_off, n_p), :],
                  preferred_element_type=jnp.float32)
    acc = acc + b_ref[0]

    is_last = l == n_layers - 1
    row_off = pl.multiple_of(i * tm, 128)

    @pl.when(is_last)
    def _():
        # conv4: no activation; write the resident output tile (HBM writeback
        # happens once, after the final grid step).
        o_ref[pl.ds(row_off, tm), :] = acc

    @pl.when(jnp.logical_not(is_last))
    def _():
        # F.elu (alpha=1).  exp(min(.,0)) - 1: argument clamped so the unselected
        # branch never overflows; the expm1 precision delta is below bf16 noise.
        act = jnp.where(acc > 0.0, acc, jnp.exp(jnp.minimum(acc, 0.0)) - 1.0)
        # Epilogue fusion: next layer's H @ W for this row tile, overlapped with
        # the streaming of the next A tile instead of stalling at layer start.
        nxt_off = pl.multiple_of(((l + 1) % 2) * n_p + i * tm, 128)
        hw_ref[pl.ds(nxt_off, tm), :] = jnp.dot(
            act.astype(jnp.bfloat16), wn_ref[0],
            preferred_element_type=jnp.float32).astype(jnp.bfloat16)


def build_norm_adj(edge_index, num_nodes, dtype=jnp.float32):
    """Dense D^{-1/2} (A + I) D^{-1/2}, matching GCNConv(add_self_loops=True)."""
    src = edge_index[0]
    dst = edge_index[1]
    a = jnp.zeros((num_nodes, num_nodes), jnp.float32)
    a = a.at[dst, src].set(1.0)                       # edge j -> i lands in row i, col j
    a = a + jnp.eye(num_nodes, dtype=jnp.float32)     # self loops
    deg = a.sum(axis=1)
    d_inv_sqrt = jnp.where(deg > 0, jax.lax.rsqrt(deg), 0.0)
    return (d_inv_sqrt[:, None] * a * d_inv_sqrt[None, :]).astype(dtype)


def init_params(key, in_features, hidden_size, out_size):
    """Deterministic glorot-uniform weights + zero biases (GCNConv shapes)."""
    dims = [(in_features, hidden_size), (hidden_size, hidden_size),
            (hidden_size, hidden_size), (hidden_size, out_size)]
    params = []
    for fi, fo in dims:
        key, kw = jax.random.split(key)
        scale = (6.0 / (fi + fo)) ** 0.5
        w = jax.random.uniform(kw, (fi, fo), jnp.float32, -scale, scale)
        b = jnp.zeros((fo,), jnp.float32)
        params.append((w, b))
    return params


def gcn_forward(x, edge_index, batch, params, *, max_tm=None):
    del batch  # unused in the reference forward (no pooling)
    n, fin = x.shape
    out_size = params[-1][0].shape[1]
    n_layers = len(params)

    # One common padded feature width for every layer (all pad to 128 here).
    f_p = _round_up(max([fin] + [w.shape[0] for w, _ in params]
                        + [w.shape[1] for w, _ in params]), 128)
    n_p = _round_up(n, 128)

    def pad2(m, rows, cols):
        return jnp.pad(m, ((0, rows - m.shape[0]), (0, cols - m.shape[1])))

    # Zero padding is exact: padded A rows/cols never contaminate real outputs.
    a_p = pad2(build_norm_adj(edge_index, n, dtype=jnp.bfloat16), n_p, n_p)

    # HW_0 = X @ W_0 precomputed in the wrapper (tiny), bf16-in / f32-acc like the kernel.
    w0 = params[0][0]
    hw0 = jnp.dot(x.astype(jnp.bfloat16), w0.astype(jnp.bfloat16),
                  preferred_element_type=jnp.float32).astype(jnp.bfloat16)
    hw0_p = pad2(hw0, n_p, f_p)

    # W stack shifted by one: layer l's epilogue needs W_{l+1}; the last entry is a
    # (unused) duplicate so the index map stays a trivial (l, 0, 0).
    w_next = [params[min(l + 1, n_layers - 1)][0] for l in range(n_layers)]
    w_stack = jnp.stack([pad2(w, f_p, f_p) for w in w_next]).astype(jnp.bfloat16)
    b_stack = jnp.stack([pad2(b[None, :], 1, f_p) for _, b in params])  # (L,1,F_p) f32

    cap = _vmem_capacity_bytes()
    budget = int(cap * 0.82)          # ~105 MiB on v5e/v6e, ~52 MiB on v7x

    def _run(single_buffer):
        tm = _choose_tm(n_p, f_p, budget, max_tm=max_tm, single_buffer=single_buffer)
        need = _vmem_need_bytes(tm, n_p, f_p, single_buffer)
        vmem_limit = int(min(int(cap * 0.92), max(32 * 1024 * 1024, int(need * 1.3))))

        def spec(shape, index_map, single):
            if single:
                return pl.BlockSpec(shape, index_map, pipeline_mode=pl.Buffered(1))
            return pl.BlockSpec(shape, index_map)

        out = pl.pallas_call(
            _gcn_fused_kernel,
            out_shape=jax.ShapeDtypeStruct((n_p, f_p), jnp.float32),
            grid=(n_layers, n_p // tm),
            in_specs=[
                spec((n_p, f_p), lambda l, i: (0, 0), single_buffer),        # HW_0
                spec((tm, n_p), lambda l, i: (i, 0),
                     single_buffer and tm == n_p),                           # A tiles
                pl.BlockSpec((1, f_p, f_p), lambda l, i: (l, 0, 0)),         # W_{l+1}
                pl.BlockSpec((1, 1, f_p), lambda l, i: (l, 0, 0)),           # b_l
            ],
            out_specs=pl.BlockSpec((n_p, f_p), lambda l, i: (0, 0)),         # resident out
            scratch_shapes=[pltpu.VMEM((2 * n_p, f_p), jnp.bfloat16)],       # H@W ping-pong
            compiler_params=pltpu.CompilerParams(
                dimension_semantics=("arbitrary", "arbitrary"),
                vmem_limit_bytes=vmem_limit,
            ),
        )(hw0_p, a_p, w_stack, b_stack)
        return jax.block_until_ready(out)

    try:
        out = _run(True)
    except Exception:
        # pipeline_mode=pl.Buffered(1) not supported on this runtime: rebuild with
        # default double-buffering (identical math, slightly larger VMEM footprint).
        out = _run(False)
    return out[:n, :out_size]


def gcn_reference(x, edge_index, params):
    """Pure f32 reference of the original module's forward."""
    a = build_norm_adj(edge_index, x.shape[0])
    h = x
    for i, (w, b) in enumerate(params):
        h = a @ (h @ w) + b
        if i < len(params) - 1:
            h = jnp.where(h > 0, h, jnp.expm1(h))
    return h


def gcn_reference_bf16(x, edge_index, params):
    """Reference emulating the kernel's bf16-input / f32-accumulate precision."""
    a = build_norm_adj(edge_index, x.shape[0]).astype(jnp.bfloat16)
    h = x.astype(jnp.bfloat16)
    out = None
    for i, (w, b) in enumerate(params):
        hw = jnp.dot(h, w.astype(jnp.bfloat16),
                     preferred_element_type=jnp.float32).astype(jnp.bfloat16)
        z = jnp.dot(a, hw, preferred_element_type=jnp.float32) + b
        if i < len(params) - 1:
            z = jnp.where(z > 0, z, jnp.exp(jnp.minimum(z, 0.0)) - 1.0)
            h = z.astype(jnp.bfloat16)
        else:
            out = z
    return out


if __name__ == "__main__":
    key = jax.random.PRNGKey(0)

    def make_graph(k, n_nodes, n_edges, in_features):
        kx, ke1, ke2 = jax.random.split(k, 3)
        xs = jax.random.normal(kx, (n_nodes, in_features), jnp.float32)
        src = jax.random.randint(ke1, (n_edges,), 0, n_nodes)
        dst = (src + 1 + jax.random.randint(ke2, (n_edges,), 0, n_nodes - 1)) % n_nodes
        e = jnp.stack([src, dst]).astype(jnp.int32)
        return xs, e

    in_features, hidden_size, out_size = 8, 32, 4
    kg1, kg2, kp = jax.random.split(key, 3)
    params = init_params(kp, in_features, hidden_size, out_size)

    # Test 1: small graph (single A tile -> A read from HBM once, fully resident).
    n_nodes, n_edges = 16, 32
    x, edge_index = make_graph(kg1, n_nodes, n_edges, in_features)
    batch = jnp.zeros((n_nodes,), jnp.int32)  # unused by the forward pass
    out = jax.block_until_ready(gcn_forward(x, edge_index, batch, params))
    assert out.shape == (n_nodes, out_size)
    ref16 = gcn_reference_bf16(x, edge_index, params)
    ref32 = gcn_reference(x, edge_index, params)
    assert jnp.allclose(out, ref16, atol=2e-3, rtol=2e-3), \
        float(jnp.max(jnp.abs(out - ref16)))
    assert jnp.allclose(out, ref32, atol=1e-1, rtol=1e-1), \
        float(jnp.max(jnp.abs(out - ref32)))

    # Test 2: force the streamed multi-row-tile path (grid = (4 layers, 2 A tiles)).
    n_nodes2, n_edges2 = 200, 600
    x2, e2 = make_graph(kg2, n_nodes2, n_edges2, in_features)
    batch2 = jnp.zeros((n_nodes2,), jnp.int32)
    out2 = jax.block_until_ready(gcn_forward(x2, e2, batch2, params, max_tm=128))
    assert out2.shape == (n_nodes2, out_size)
    ref16_2 = gcn_reference_bf16(x2, e2, params)
    assert jnp.allclose(out2, ref16_2, atol=2e-3, rtol=2e-3), \
        float(jnp.max(jnp.abs(out2 - ref16_2)))

    # TODO(synk): for genuinely large sparse graphs, replace the dense O(N^2) adjacency
    # with a scalar-prefetch gather SpMM (neighbor lists indexed via PrefetchScalarGridSpec).
    print("KERNEL_OK")
</pallas_src>

<mosaic_0001>
module attributes {stable_mosaic.version = 11 : i64} {
  func.func @_gcn_fused_kernel(%arg0: i32, %arg1: i32, %arg2: memref<128x128xbf16, #tpu.memory_space<vmem>>, %arg3: memref<128x128xbf16, #tpu.memory_space<vmem>>, %arg4: memref<1x128x128xbf16, #tpu.memory_space<vmem>>, %arg5: memref<1x1x128xf32, #tpu.memory_space<vmem>>, %arg6: memref<128x128xf32, #tpu.memory_space<vmem>>, %arg7: memref<256x128xbf16, #tpu.memory_space<vmem>>) attributes {dimension_semantics = [#tpu.dimension_semantics<arbitrary>, #tpu.dimension_semantics<arbitrary>], iteration_bounds = array<i64: 4, 1>, scalar_prefetch = 0 : i64, scratch_operands = 1 : i64, tpu.core_type = #tpu.core_type<tc>, window_params = [{pipeline_mode = #tpu.pipeline_mode<synchronous>, transform_indices = @transform_0, window_bounds = array<i64: 128, 128>}, {pipeline_mode = #tpu.pipeline_mode<synchronous>, transform_indices = @transform_1, window_bounds = array<i64: 128, 128>}, {transform_indices = @transform_2, window_bounds = array<i64: 1, 128, 128>}, {transform_indices = @transform_3, window_bounds = array<i64: 1, 1, 128>}, {pipeline_mode = #tpu.pipeline_mode<synchronous>, transform_indices = @transform_4, window_bounds = array<i64: 128, 128>}]} {
    %c0_i32 = arith.constant 0 : i32
    %0 = arith.cmpi eq, %arg0, %c0_i32 : i32
    %c0_i32_0 = arith.constant 0 : i32
    %1 = arith.cmpi eq, %arg1, %c0_i32_0 : i32
    %2 = arith.andi %0, %1 : i1
    %3 = arith.extui %2 : i1 to i32
    %c0_i32_1 = arith.constant 0 : i32
    %4 = arith.cmpi ne, %3, %c0_i32_1 : i32
    scf.if %4 {
      %c0_14 = arith.constant 0 : index
      %c0_15 = arith.constant 0 : index
      %33 = vector.load %arg2[%c0_14, %c0_15] : memref<128x128xbf16, #tpu.memory_space<vmem>>, vector<128x128xbf16>
      %c0_16 = arith.constant 0 : index
      %c0_17 = arith.constant 0 : index
      %34 = vector.load %arg7[%c0_16, %c0_17] : memref<256x128xbf16, #tpu.memory_space<vmem>>, vector<128x128xbf16>
      tpu.vector_store %arg7[%c0_16, %c0_17], %33 {strides = array<i32>} : memref<256x128xbf16, #tpu.memory_space<vmem>>, vector<128x128xbf16>,
    } else {
    }
    %c2_i32 = arith.constant 2 : i32
    %c0_i32_2 = arith.constant 0 : i32
    %5 = arith.cmpi eq, %c2_i32, %c0_i32_2 : i32
    %c1_i32 = arith.constant 1 : i32
    %6 = arith.select %5, %c1_i32, %c2_i32 : i32
    %7 = arith.remsi %arg0, %6 : i32
    %c0_i32_3 = arith.constant 0 : i32
    %8 = arith.cmpi ne, %7, %c0_i32_3 : i32
    %c0_i32_4 = arith.constant 0 : i32
    %9 = arith.cmpi slt, %7, %c0_i32_4 : i32
    %c0_i32_5 = arith.constant 0 : i32
    %10 = arith.cmpi slt, %6, %c0_i32_5 : i32
    %11 = arith.xori %9, %10 : i1
    %12 = arith.andi %11, %8 : i1
    %13 = arith.addi %7, %6 : i32
    %14 = arith.select %12, %13, %7 : i32
    %c128_i32 = arith.constant 128 : i32
    %15 = arith.muli %14, %c128_i32 : i32
    %16 = tpu.assume_multiple %15, 128 : i32
    %c0 = arith.constant 0 : index
    %c0_6 = arith.constant 0 : index
    %17 = vector.load %arg3[%c0, %c0_6] : memref<128x128xbf16, #tpu.memory_space<vmem>>, vector<128x128xbf16>
    %18 = arith.index_cast %16 : i32 to index
    %c0_7 = arith.constant 0 : index
    %19 = vector.load %arg7[%18, %c0_7] : memref<256x128xbf16, #tpu.memory_space<vmem>>, vector<128x128xbf16>
    %cst = arith.constant dense<0.000000e+00> : vector<128x128xf32>
    %20 = tpu.matmul %17, %19, %cst {dimension_numbers = #tpu.dot_dimension_numbers<[1], [0], [0], [1], [0, 0, 1, 1], [], []>} : vector<128x128xbf16>, vector<128x128xbf16>, vector<128x128xf32> -> vector<128x128xf32>
    %c0_8 = arith.constant 0 : index
    %c0_9 = arith.constant 0 : index
    %c0_10 = arith.constant 0 : index
    %21 = vector.load %arg5[%c0_8, %c0_9, %c0_10] : memref<1x1x128xf32, #tpu.memory_space<vmem>>, vector<1x1x128xf32>
    %22 = vector.shape_cast %21 : vector<1x1x128xf32> to vector<1x128xf32>
    %23 = vector.broadcast %22 : vector<1x128xf32> to vector<128x128xf32>
    %24 = arith.addf %20, %23 : vector<128x128xf32>
    %c3_i32 = arith.constant 3 : i32
    %25 = arith.cmpi eq, %arg0, %c3_i32 : i32
    %c128_i32_11 = arith.constant 128 : i32
    %26 = arith.muli %arg1, %c128_i32_11 : i32
    %27 = tpu.assume_multiple %26, 128 : i32
    %28 = arith.extui %25 : i1 to i32
    %c0_i32_12 = arith.constant 0 : i32
    %29 = arith.cmpi ne, %28, %c0_i32_12 : i32
    scf.if %29 {
      %33 = arith.index_cast %27 : i32 to index
      %c0_14 = arith.constant 0 : index
      %34 = vector.load %arg6[%33, %c0_14] : memref<128x128xf32, #tpu.memory_space<vmem>>, vector<128x128xf32>
      tpu.vector_store %arg6[%33, %c0_14], %24 {strides = array<i32>} : memref<128x128xf32, #tpu.memory_space<vmem>>, vector<128x128xf32>,
    } else {
    }
    %true = arith.constant true
    %30 = arith.xori %25, %true : i1
    %31 = arith.extui %30 : i1 to i32
    %c0_i32_13 = arith.constant 0 : i32
    %32 = arith.cmpi ne, %31, %c0_i32_13 : i32
    scf.if %32 {
      %cst_14 = arith.constant 0.000000e+00 : f32
      %33 = vector.broadcast %cst_14 : f32 to vector<128x128xf32>
      %34 = arith.cmpf ogt, %24, %33 : vector<128x128xf32>
      %cst_15 = arith.constant 0.000000e+00 : f32
      %35 = vector.broadcast %cst_15 : f32 to vector<128x128xf32>
      %36 = arith.minimumf %24, %35 : vector<128x128xf32>
      %37 = math.exp %36 : vector<128x128xf32>
      %cst_16 = arith.constant 1.000000e+00 : f32
      %38 = vector.broadcast %cst_16 : f32 to vector<128x128xf32>
      %39 = arith.subf %37, %38 : vector<128x128xf32>
      %40 = arith.select %34, %24, %39 : vector<128x128xi1>, vector<128x128xf32>
      %c1_i32_17 = arith.constant 1 : i32
      %41 = arith.addi %arg0, %c1_i32_17 : i32
      %c2_i32_18 = arith.constant 2 : i32
      %c0_i32_19 = arith.constant 0 : i32
      %42 = arith.cmpi eq, %c2_i32_18, %c0_i32_19 : i32
      %c1_i32_20 = arith.constant 1 : i32
      %43 = arith.select %42, %c1_i32_20, %c2_i32_18 : i32
      %44 = arith.remsi %41, %43 : i32
      %c0_i32_21 = arith.constant 0 : i32
      %45 = arith.cmpi ne, %44, %c0_i32_21 : i32
      %c0_i32_22 = arith.constant 0 : i32
      %46 = arith.cmpi slt, %44, %c0_i32_22 : i32
      %c0_i32_23 = arith.constant 0 : i32
      %47 = arith.cmpi slt, %43, %c0_i32_23 : i32
      %48 = arith.xori %46, %47 : i1
      %49 = arith.andi %48, %45 : i1
      %50 = arith.addi %44, %43 : i32
      %51 = arith.select %49, %50, %44 : i32
      %c128_i32_24 = arith.constant 128 : i32
      %52 = arith.muli %51, %c128_i32_24 : i32
      %c128_i32_25 = arith.constant 128 : i32
      %53 = arith.muli %arg1, %c128_i32_25 : i32
      %54 = arith.addi %52, %53 : i32
      %55 = tpu.assume_multiple %54, 128 : i32
      %56 = arith.truncf %40 : vector<128x128xf32> to vector<128x128xbf16>
      %c0_26 = arith.constant 0 : index
      %c0_27 = arith.constant 0 : index
      %c0_28 = arith.constant 0 : index
      %57 = vector.load %arg4[%c0_26, %c0_27, %c0_28] : memref<1x128x128xbf16, #tpu.memory_space<vmem>>, vector<1x128x128xbf16>
      %58 = vector.shape_cast %57 : vector<1x128x128xbf16> to vector<128x128xbf16>
      %cst_29 = arith.constant dense<0.000000e+00> : vector<128x128xf32>
      %59 = tpu.matmul %56, %58, %cst_29 {dimension_numbers = #tpu.dot_dimension_numbers<[1], [0], [0], [1], [0, 0, 1, 1], [], []>} : vector<128x128xbf16>, vector<128x128xbf16>, vector<128x128xf32> -> vector<128x128xf32>
      %60 = arith.truncf %59 : vector<128x128xf32> to vector<128x128xbf16>
      %61 = arith.index_cast %55 : i32 to index
      %c0_30 = arith.constant 0 : index
      %62 = vector.load %arg7[%61, %c0_30] : memref<256x128xbf16, #tpu.memory_space<vmem>>, vector<128x128xbf16>
      tpu.vector_store %arg7[%61, %c0_30], %60 {strides = array<i32>} : memref<256x128xbf16, #tpu.memory_space<vmem>>, vector<128x128xbf16>,
    } else {
    }
    return
  }
  func.func @transform_0(%arg0: i32, %arg1: i32) -> (i32, i32) {
    %c0_i32 = arith.constant 0 : i32
    %c0_i32_0 = arith.constant 0 : i32
    %c0_i32_1 = arith.constant 0 : i32
    return %c0_i32, %c0_i32_0 : i32, i32
  }
  func.func @transform_1(%arg0: i32, %arg1: i32) -> (i32, i32) {
    %c0_i32 = arith.constant 0 : i32
    %c0_i32_0 = arith.constant 0 : i32
    return %arg1, %c0_i32 : i32, i32
  }
  func.func @transform_2(%arg0: i32, %arg1: i32) -> (i32, i32, i32) {
    %c0_i32 = arith.constant 0 : i32
    %c0_i32_0 = arith.constant 0 : i32
    %c0_i32_1 = arith.constant 0 : i32
    return %arg0, %c0_i32, %c0_i32_0 : i32, i32, i32
  }
  func.func @transform_3(%arg0: i32, %arg1: i32) -> (i32, i32, i32) {
    %c0_i32 = arith.constant 0 : i32
    %c0_i32_0 = arith.constant 0 : i32
    %c0_i32_1 = arith.constant 0 : i32
    return %arg0, %c0_i32, %c0_i32_0 : i32, i32, i32
  }
  func.func @transform_4(%arg0: i32, %arg1: i32) -> (i32, i32) {
    %c0_i32 = arith.constant 0 : i32
    %c0_i32_0 = arith.constant 0 : i32
    %c0_i32_1 = arith.constant 0 : i32
    return %c0_i32, %c0_i32_0 : i32, i32
  }
}

module attributes {stable_mosaic.version = 11 : i64} {
  func.func @_gcn_fused_kernel(%arg0: i32, %arg1: i32, %arg2: memref<128x128xbf16, #tpu.memory_space<vmem>>, %arg3: memref<128x128xbf16, #tpu.memory_space<vmem>>, %arg4: memref<1x128x128xbf16, #tpu.memory_space<vmem>>, %arg5: memref<1x1x128xf32, #tpu.memory_space<vmem>>, %arg6: memref<128x128xf32, #tpu.memory_space<vmem>>, %arg7: memref<256x128xbf16, #tpu.memory_space<vmem>>) attributes {dimension_semantics = [#tpu.dimension_semantics<arbitrary>, #tpu.dimension_semantics<arbitrary>], iteration_bounds = array<i64: 4, 1>, scalar_prefetch = 0 : i64, scratch_operands = 1 : i64, tpu.core_type = #tpu.core_type<tc>, window_params = [{pipeline_mode = #tpu.pipeline_mode<synchronous>, transform_indices = @transform_0, window_bounds = array<i64: 128, 128>}, {transform_indices = @transform_1, window_bounds = array<i64: 128, 128>}, {transform_indices = @transform_2, window_bounds = array<i64: 1, 128, 128>}, {transform_indices = @transform_3, window_bounds = array<i64: 1, 1, 128>}, {pipeline_mode = #tpu.pipeline_mode<synchronous>, transform_indices = @transform_4, window_bounds = array<i64: 128, 128>}]} {
    %c0_i32 = arith.constant 0 : i32
    %0 = arith.cmpi eq, %arg0, %c0_i32 : i32
    %c0_i32_0 = arith.constant 0 : i32
    %1 = arith.cmpi eq, %arg1, %c0_i32_0 : i32
    %2 = arith.andi %0, %1 : i1
    %3 = arith.extui %2 : i1 to i32
    %c0_i32_1 = arith.constant 0 : i32
    %4 = arith.cmpi ne, %3, %c0_i32_1 : i32
    scf.if %4 {
      %c0_14 = arith.constant 0 : index
      %c0_15 = arith.constant 0 : index
      %33 = vector.load %arg2[%c0_14, %c0_15] : memref<128x128xbf16, #tpu.memory_space<vmem>>, vector<128x128xbf16>
      %c0_16 = arith.constant 0 : index
      %c0_17 = arith.constant 0 : index
      %34 = vector.load %arg7[%c0_16, %c0_17] : memref<256x128xbf16, #tpu.memory_space<vmem>>, vector<128x128xbf16>
      tpu.vector_store %arg7[%c0_16, %c0_17], %33 {strides = array<i32>} : memref<256x128xbf16, #tpu.memory_space<vmem>>, vector<128x128xbf16>,
    } else {
    }
    %c2_i32 = arith.constant 2 : i32
    %c0_i32_2 = arith.constant 0 : i32
    %5 = arith.cmpi eq, %c2_i32, %c0_i32_2 : i32
    %c1_i32 = arith.constant 1 : i32
    %6 = arith.select %5, %c1_i32, %c2_i32 : i32
    %7 = arith.remsi %arg0, %6 : i32
    %c0_i32_3 = arith.constant 0 : i32
    %8 = arith.cmpi ne, %7, %c0_i32_3 : i32
    %c0_i32_4 = arith.constant 0 : i32
    %9 = arith.cmpi slt, %7, %c0_i32_4 : i32
    %c0_i32_5 = arith.constant 0 : i32
    %10 = arith.cmpi slt, %6, %c0_i32_5 : i32
    %11 = arith.xori %9, %10 : i1
    %12 = arith.andi %11, %8 : i1
    %13 = arith.addi %7, %6 : i32
    %14 = arith.select %12, %13, %7 : i32
    %c128_i32 = arith.constant 128 : i32
    %15 = arith.muli %14, %c128_i32 : i32
    %16 = tpu.assume_multiple %15, 128 : i32
    %c0 = arith.constant 0 : index
    %c0_6 = arith.constant 0 : index
    %17 = vector.load %arg3[%c0, %c0_6] : memref<128x128xbf16, #tpu.memory_space<vmem>>, vector<128x128xbf16>
    %18 = arith.index_cast %16 : i32 to index
    %c0_7 = arith.constant 0 : index
    %19 = vector.load %arg7[%18, %c0_7] : memref<256x128xbf16, #tpu.memory_space<vmem>>, vector<128x128xbf16>
    %cst = arith.constant dense<0.000000e+00> : vector<128x128xf32>
    %20 = tpu.matmul %17, %19, %cst {dimension_numbers = #tpu.dot_dimension_numbers<[1], [0], [0], [1], [0, 0, 1, 1], [], []>} : vector<128x128xbf16>, vector<128x128xbf16>, vector<128x128xf32> -> vector<128x128xf32>
    %c0_8 = arith.constant 0 : index
    %c0_9 = arith.constant 0 : index
    %c0_10 = arith.constant 0 : index
    %21 = vector.load %arg5[%c0_8, %c0_9, %c0_10] : memref<1x1x128xf32, #tpu.memory_space<vmem>>, vector<1x1x128xf32>
    %22 = vector.shape_cast %21 : vector<1x1x128xf32> to vector<1x128xf32>
    %23 = vector.broadcast %22 : vector<1x128xf32> to vector<128x128xf32>
    %24 = arith.addf %20, %23 : vector<128x128xf32>
    %c3_i32 = arith.constant 3 : i32
    %25 = arith.cmpi eq, %arg0, %c3_i32 : i32
    %c128_i32_11 = arith.constant 128 : i32
    %26 = arith.muli %arg1, %c128_i32_11 : i32
    %27 = tpu.assume_multiple %26, 128 : i32
    %28 = arith.extui %25 : i1 to i32
    %c0_i32_12 = arith.constant 0 : i32
    %29 = arith.cmpi ne, %28, %c0_i32_12 : i32
    scf.if %29 {
      %33 = arith.index_cast %27 : i32 to index
      %c0_14 = arith.constant 0 : index
      %34 = vector.load %arg6[%33, %c0_14] : memref<128x128xf32, #tpu.memory_space<vmem>>, vector<128x128xf32>
      tpu.vector_store %arg6[%33, %c0_14], %24 {strides = array<i32>} : memref<128x128xf32, #tpu.memory_space<vmem>>, vector<128x128xf32>,
    } else {
    }
    %true = arith.constant true
    %30 = arith.xori %25, %true : i1
    %31 = arith.extui %30 : i1 to i32
    %c0_i32_13 = arith.constant 0 : i32
    %32 = arith.cmpi ne, %31, %c0_i32_13 : i32
    scf.if %32 {
      %cst_14 = arith.constant 0.000000e+00 : f32
      %33 = vector.broadcast %cst_14 : f32 to vector<128x128xf32>
      %34 = arith.cmpf ogt, %24, %33 : vector<128x128xf32>
      %cst_15 = arith.constant 0.000000e+00 : f32
      %35 = vector.broadcast %cst_15 : f32 to vector<128x128xf32>
      %36 = arith.minimumf %24, %35 : vector<128x128xf32>
      %37 = math.exp %36 : vector<128x128xf32>
      %cst_16 = arith.constant 1.000000e+00 : f32
      %38 = vector.broadcast %cst_16 : f32 to vector<128x128xf32>
      %39 = arith.subf %37, %38 : vector<128x128xf32>
      %40 = arith.select %34, %24, %39 : vector<128x128xi1>, vector<128x128xf32>
      %c1_i32_17 = arith.constant 1 : i32
      %41 = arith.addi %arg0, %c1_i32_17 : i32
      %c2_i32_18 = arith.constant 2 : i32
      %c0_i32_19 = arith.constant 0 : i32
      %42 = arith.cmpi eq, %c2_i32_18, %c0_i32_19 : i32
      %c1_i32_20 = arith.constant 1 : i32
      %43 = arith.select %42, %c1_i32_20, %c2_i32_18 : i32
      %44 = arith.remsi %41, %43 : i32
      %c0_i32_21 = arith.constant 0 : i32
      %45 = arith.cmpi ne, %44, %c0_i32_21 : i32
      %c0_i32_22 = arith.constant 0 : i32
      %46 = arith.cmpi slt, %44, %c0_i32_22 : i32
      %c0_i32_23 = arith.constant 0 : i32
      %47 = arith.cmpi slt, %43, %c0_i32_23 : i32
      %48 = arith.xori %46, %47 : i1
      %49 = arith.andi %48, %45 : i1
      %50 = arith.addi %44, %43 : i32
      %51 = arith.select %49, %50, %44 : i32
      %c128_i32_24 = arith.constant 128 : i32
      %52 = arith.muli %51, %c128_i32_24 : i32
      %c128_i32_25 = arith.constant 128 : i32
      %53 = arith.muli %arg1, %c128_i32_25 : i32
      %54 = arith.addi %52, %53 : i32
      %55 = tpu.assume_multiple %54, 128 : i32
      %56 = arith.truncf %40 : vector<128x128xf32> to vector<128x128xbf16>
      %c0_26 = arith.constant 0 : index
      %c0_27 = arith.constant 0 : index
      %c0_28 = arith.constant 0 : index
      %57 = vector.load %arg4[%c0_26, %c0_27, %c0_28] : memref<1x128x128xbf16, #tpu.memory_space<vmem>>, vector<1x128x128xbf16>
      %58 = vector.shape_cast %57 : vector<1x128x128xbf16> to vector<128x128xbf16>
      %cst_29 = arith.constant dense<0.000000e+00> : vector<128x128xf32>
      %59 = tpu.matmul %56, %58, %cst_29 {dimension_numbers = #tpu.dot_dimension_numbers<[1], [0], [0], [1], [0, 0, 1, 1], [], []>} : vector<128x128xbf16>, vector<128x128xbf16>, vector<128x128xf32> -> vector<128x128xf32>
      %60 = arith.truncf %59 : vector<128x128xf32> to vector<128x128xbf16>
      %61 = arith.index_cast %55 : i32 to index
      %c0_30 = arith.constant 0 : index
      %62 = vector.load %arg7[%61, %c0_30] : memref<256x128xbf16, #tpu.memory_space<vmem>>, vector<128x128xbf16>
      tpu.vector_store %arg7[%61, %c0_30], %60 {strides = array<i32>} : memref<256x128xbf16, #tpu.memory_space<vmem>>, vector<128x128xbf16>,
    } else {
    }
    return
  }
  func.func @transform_0(%arg0: i32, %arg1: i32) -> (i32, i32) {
    %c0_i32 = arith.constant 0 : i32
    %c0_i32_0 = arith.constant 0 : i32
    %c0_i32_1 = arith.constant 0 : i32
    return %c0_i32, %c0_i32_0 : i32, i32
  }
  func.func @transform_1(%arg0: i32, %arg1: i32) -> (i32, i32) {
    %c0_i32 = arith.constant 0 : i32
    %c0_i32_0 = arith.constant 0 : i32
    return %arg1, %c0_i32 : i32, i32
  }
  func.func @transform_2(%arg0: i32, %arg1: i32) -> (i32, i32, i32) {
    %c0_i32 = arith.constant 0 : i32
    %c0_i32_0 = arith.constant 0 : i32
    %c0_i32_1 = arith.constant 0 : i32
    return %arg0, %c0_i32, %c0_i32_0 : i32, i32, i32
  }
  func.func @transform_3(%arg0: i32, %arg1: i32) -> (i32, i32, i32) {
    %c0_i32 = arith.constant 0 : i32
    %c0_i32_0 = arith.constant 0 : i32
    %c0_i32_1 = arith.constant 0 : i32
    return %arg0, %c0_i32, %c0_i32_0 : i32, i32, i32
  }
  func.func @transform_4(%arg0: i32, %arg1: i32) -> (i32, i32) {
    %c0_i32 = arith.constant 0 : i32
    %c0_i32_0 = arith.constant 0 : i32
    %c0_i32_1 = arith.constant 0 : i32
    return %c0_i32, %c0_i32_0 : i32, i32
  }
}

</mosaic_0001>

<bundles_post_ra>
// kernel: tpu_custom_call.1
= control target key start
LH: loop header
LB: loop body
LE: loop exit
PB: predicated region body
PF: predicated region fallthrough
CT: control target
= control target key end

     0   :  { %9 = vsyncpa [#allocation4], 0  ;;  %s1890_s0 = inlined_call_operand.hbm [shape: bf16[128,128], index: 0, kind: input, shape index: {}]   ;;  %s1891_s1 = inlined_call_operand.hbm [shape: bf16[128,128], index: 1, kind: input, shape index: {}]   ;;  %s1892_s2 = inlined_call_operand.hbm [shape: bf16[4,128,128], index: 2, kind: input, shape index: {}]   ;;  %s1893_s3 = inlined_call_operand.vmem [shape: f32[4,1,128], index: 3, kind: input, shape index: {}]   ;;  %s1894_s4 = inlined_call_operand.hbm [shape: f32[128,128], index: 4, kind: output, shape index: {}]  }
   0x1   :  { %10 = vsyncpa [#allocation7], 0 }
   0x2   :  { %11 = vsyncpa [#allocation5], 0  ;;  %s1520_s15 = smov 0   ;;  %s1522_s16 = smov 0  }
   0x3   :  { %s1524_s17 = smov 0   ;;  %s1526_s18 = smov 0  }
   0x4   :  { %s1528_s19 = smov 0   ;;  %s1530_s20 = smov 0  }
   0x5 LB: > { %s1549_s21 = sadd.s32 4294967295, %s1485_s20   ;;  %p90_p0 = scmp.ne.s32.totalorder %s1473_s17, %s1469_s16  ;;  %s1485_s20 = sphi %s1530_s20, %s17_s20   ;;  %s1481_s19 = sphi %s1528_s19, %s1914_s19   ;;  %s1477_s18 = sphi %s1526_s18, %s1913_s18   ;;  %s1473_s17 = sphi %s1524_s17, %s1912_s17   ;;  %s1469_s16 = sphi %s1522_s16, %s1911_s16   ;;  %s1465_s15 = sphi %s1520_s15, %s1910_s15  }
   0x6   : > { %p91_p1 = scmp.eq.s32.totalorder %s1485_s20, 0  ;;  %p96_p2 = scmp.ne.s32.totalorder %s1469_s16, %s1465_s15 }
   0x7   : > { %p1895_p3 = scmp.eq.s32.totalorder %s1549_s21, 0  ;;  %p969_p4 = scmp.ge.s32.totalorder %s1485_s20, 1 }
   0x8   : > { %p92_p5 = por %p91_p1, %p90_p0  ;;  %p154_p6 = scmp.lt.s32.totalorder %s1485_s20, 5 }
   0x9   : > { %p1560_p7 = por %p1895_p3, %p96_p2  ;;  %s1487_s24 = smov [#allocation3]  }
   0xa   : > { %p1564_p8 = pnand %p969_p4, %p154_p6  ;;  %s166_s25 = sshll.u32 %s1487_s24, 4  ;;  %s167_s25 = int_to_ptr.vmem [resolvable:$true] %s166_s25 }
   0xb   : > { %s1899_s22 = scalar_select %p1560_p7, 1, 0 }
   0xc   : > { %s1900_s23 = scalar_select %p1564_p8, 1, 0 }
   0xd   : > { %p1182_p9 = pneg %p1564_p8  ;;  %p1195_p11 = scmp.lt.s32.totalorder %s1485_s20, 4 }
   0xe   : > { %s1311_s30 = scalar_lea.hbm %s1890_s0, 1024 }
   0xf   : > { %p1572_p10 = pnand %p1182_p9, %p1895_p3  ;;  %p1577_p12 = pnand %p1195_p11, %p92_p5 }
  0x10   : > { %p1312_p13 = scmp.ne.s32.totalorder %s1890_s0, %s1311_s30  ;;  %p1318_p4 = scmp.lt.u32.totalorder %s1311_s30, %s1890_s0 }
  0x11   : > { %s1902_s27 = scalar_select %p1577_p12, 1, 0 }
  0x12   : > { %p1313_p0 = pneg %p1572_p10 }
  0x14   : > { %p1314_p1 = pnand %p1313_p0, %p1312_p13 }
  0x16   : > { %p1315_p2 = pneg %p1314_p1 }
  0x18   : > { %p1320_p5 = pnand %p1318_p4, %p1315_p2 }
  0x1a   : > { %1323 = shalt.err (!%p1320_p5)
}
  0x1b   : > { %s1324_s9 = scalar_lea.vmem %s167_s25, 1024  ;;  %p1332_p3 = scmp.lt.s32.totalorder %s167_s25, %s167_s25 }
  0x1c   : > { %p1325_p6 = scmp.ne.s32.totalorder %s167_s25, %s1324_s9  ;;  %p1333_p7 = scmp.lt.s32.totalorder %s1324_s9, %s1324_s9 }
  0x1e   : > { %p1327_p9 = pnand %p1325_p6, %p1313_p0  ;;  %p1334_p8 = por %p1333_p7, %p1332_p3 }
  0x20   : > { %p1328_p11 = pneg %p1327_p9 }
  0x22   : > { %p1335_p12 = pnand %p1334_p8, %p1328_p11 }
  0x24   : > { %1338 = shalt.err (!%p1335_p12)
}
  0x25   : > { %s1488_s10 = smov 64   ;;  %s1489_s11 = smov 4  }
  0x26   : > { %1185 = dma.hbm_to_vmem [thread:$0]  (!%p1572_p10), %s1890_s0, 1024, %s167_s25, [#allocation4], %s1488_s10, %s1488_s10, %s1489_s11  }
  0x27   : > { %s1490_s14 = smov [#allocation6]   ;;  %s1339_s29 = scalar_lea.hbm %s1891_s1, 1024 }
  0x28   : > { %s182_s15 = sshll.u32 %s1490_s14, 4  ;;  %p1340_p3 = scmp.ne.s32.totalorder %s1891_s1, %s1339_s29  ;;  %s183_s15 = int_to_ptr.vmem [resolvable:$true] %s182_s15 }
  0x29   : > { %p1346_p12 = scmp.lt.u32.totalorder %s1339_s29, %s1891_s1 }
  0x2a   : > { %p1342_p7 = pnand %p1340_p3, %p1313_p0 }
  0x2c   : > { %p1343_p8 = pneg %p1342_p7 }
  0x2e   : > { %p1348_p13 = pnand %p1346_p12, %p1343_p8 }
  0x30   : > { %1351 = shalt.err (!%p1348_p13)
}
  0x31   : > { %s1352_s25 = scalar_lea.vmem %s183_s15, 1024  ;;  %p1360_p5 = scmp.lt.s32.totalorder %s183_s15, %s183_s15 }
  0x32   : > { %p1353_p1 = scmp.ne.s32.totalorder %s183_s15, %s1352_s25  ;;  %p1361_p6 = scmp.lt.s32.totalorder %s1352_s25, %s1352_s25 }
  0x34   : > { %p1355_p2 = pnand %p1353_p1, %p1313_p0  ;;  %p1362_p9 = por %p1361_p6, %p1360_p5 }
  0x36   : > { %p1356_p4 = pneg %p1355_p2 }
  0x38   : > { %p1363_p11 = pnand %p1362_p9, %p1356_p4 }
  0x3a   : > { %1366 = shalt.err (!%p1363_p11)
}
  0x3b   : > { %1188 = dma.hbm_to_vmem [thread:$0]  (!%p1572_p10), %s1891_s1, 1024, %s183_s15, [#allocation7], %s1488_s10, %s1488_s10, %s1489_s11  }
  0x3c   : > { %s29_s12 = sadd.s32 1, %s1481_s19  ;;  %s83_s13 = sadd.s32 1, %s1473_s17 }
  0x3d   : > { %p31_p0 = scmp.ge.s32.totalorder %s29_s12, 4  ;;  %s196_s14 = sand.u32 1, %s1485_s20  }
  0x3e   : > { %s198_s26 = sand.u32 1, %s1473_s17   ;;  %s1038_s28 = sshll.u32 %s1481_s19, 10 }
  0x3f   : > { %s1916_s12 = smov (%p31_p0, %s29_s12), 0  ;;  %s973_s24 = sshll.u32 %s198_s26, 6 }
  0x40   : > { %s80_s29 = ssub.s32 %s1481_s19, %s1916_s12  ;;  %s1641_s6 = scalar_lea.hbm %s1892_s2, %s1038_s28 }
  0x41   : > { %p81_p3 = scmp.eq.s32.totalorder %s80_s29, 0  ;;  %s200_s15 = scalar_lea.vmem [#allocation8], %s973_s24 }
  0x42   : > { %s207_s7 = sshll.u32 %s200_s15, 4  ;;  %s1648_s8 = scalar_lea.sflag [#allocation4], %s196_s14  ;;  %s1646_s7 = int_to_ptr.vmem [resolvable:$true] %s207_s7 }
  0x43   : > { %s1644_s25 = scalar_select %p81_p3, %s1473_s17, %s83_s13  }
  0x44   : > { %s1367_s9 = scalar_lea.hbm %s1641_s6, 1024  ;;  %p1903_p7 = scmp.ne.s32.totalorder %s1902_s27, 0 }
  0x45   : > { %p1368_p10 = scmp.ne.s32.totalorder %s1641_s6, %s1367_s9  ;;  %s1372_s29 = scalar_lea.hbm %s1892_s2, 4096 }
  0x46   : > { %p1369_p8 = pneg %p1903_p7  ;;  %p1373_p1 = scmp.lt.u32.totalorder %s1641_s6, %s1892_s2 }
  0x47   : > { %p1374_p2 = scmp.lt.u32.totalorder %s1372_s29, %s1367_s9  ;;  %p1376_p5 = scmp.lt.u32.totalorder %s1367_s9, %s1641_s6 }
  0x48   : > { %p1370_p12 = pnand %p1369_p8, %p1368_p10 }
  0x49   : > { %p1375_p4 = por %p1374_p2, %p1373_p1 }
  0x4a   : > { %p1371_p13 = pneg %p1370_p12 }
  0x4b   : > { %p1377_p6 = por %p1376_p5, %p1375_p4 }
  0x4d   : > { %p1378_p9 = pnand %p1377_p6, %p1371_p13 }
  0x4f   : > { %1381 = shalt.err (!%p1378_p9)
}
  0x50   : > { %s1382_s13 = scalar_lea.vmem %s1646_s7, 1024  ;;  %s1491_s14 = smov [#allocation8]  }
  0x51   : > { %p1383_p11 = scmp.ne.s32.totalorder %s1646_s7, %s1382_s13  ;;  %s1387_s5 = sshll.u32 %s1491_s14, 4  ;;  %s1388_s5 = int_to_ptr.vmem [resolvable:$false] %s1387_s5 }
  0x52   : > { %s1389_s15 = scalar_lea.vmem %s1388_s5, 2048  ;;  %p1390_p10 = scmp.lt.s32.totalorder %s1646_s7, %s1388_s5 }
  0x53   : > { %p1385_p0 = pnand %p1383_p11, %p1369_p8  ;;  %p1391_p12 = scmp.lt.s32.totalorder %s1389_s15, %s1382_s13 }
  0x55   : > { %p1386_p3 = pneg %p1385_p0  ;;  %p1392_p1 = por %p1391_p12, %p1390_p10 }
  0x57   : > { %p1393_p2 = pnand %p1392_p1, %p1386_p3 }
  0x59   : > { %1396 = shalt.err (!%p1393_p2)
}
  0x5a   : > { %1192 = dma.hbm_to_vmem [thread:$0]  (!%p1903_p7), %s1641_s6, 1024, %s1646_s7, %s1648_s8, %s1488_s10, %s1488_s10, %s1489_s11  }
  0x5b   : > { %p1904_p8 = scmp.ne.s32.totalorder %s1900_s23, 0 }
  0x5c   : > { %p1905_p13 = scmp.eq.s32.totalorder (!%p1904_p8), %s1549_s21, 0 }
  0x5d   : > { %225 = sbr.rel (%p1904_p8) target bundleno = 677 (0x2a5), region = 36 }
  0x64   : > { %1448 = dma.done.wait (%p1905_p13), [#allocation4], 1024   ;;  %p1906_p4 = pmov %p1905_p13 }
  0x66   : > { %1450 = vsyncadd (%p1906_p4), [#allocation4], 4294966272  ;;  %p1907_p5 = pmov %p1906_p4 }
  0x67   : > { %p1908_p6 = pmov %p1906_p4 }
  0x68   : > { %1452 = dma.done.wait (%p1907_p5), [#allocation7], 1024  }
  0x69   : > { %1454 = vsyncadd (%p1908_p6), [#allocation7], 4294966272  ;;  %s235_s27 = sand.u32 1, %s1549_s21   ;;  %s237_s10 = sand.u32 1, %s1469_s16  }
  0x6a   : > { %s979_s11 = sshll.u32 %s237_s10, 6  ;;  %s236_s23 = scalar_lea.sflag [#allocation4], %s235_s27 }
  0x6b   : > { %s1691_s6 = scalar_lea.vmem [#allocation8], %s979_s11  ;;  %p1909_p7 = scmp.ne.s32.totalorder %s1899_s22, 0 }
  0x6d   : > { %1456 = dma.done.wait (%p1909_p7), %s236_s23, 1024  }
  0x6e   : > { %1458 = vsyncadd (%p1909_p7), %s236_s23, 4294966272  ;;  %p263_p9 = scmp.lt.s32.totalorder %s1477_s18, 3  ;;  %p267_p11 = scmp.eq.s32.totalorder %s1477_s18, 0 }
  0x6f   : > { %v1255_v0 = vld [vmem:[#allocation3] sm:$0xff] (%p267_p11)   ;;  %v1256_v1 = vld [vmem:[#allocation3 + $0x8] sm:$0xff] (%p267_p11)   ;;  %v1257_v2 = vld [vmem:[#allocation3 + $0x10] sm:$0xff] (%p267_p11)  }
  0x70   : > { %s1700_s7 = scalar_select %p263_p9, %s1477_s18, 3 }
  0x71   : > { %272 = sbr.rel (!%p267_p11) target bundleno = 120 (0x78), region = 52  ;;  %337 = vst [vmem:[#allocation2] sm:$0xff] (%p267_p11), %v1255_v0  ;;  %338 = vst [vmem:[#allocation2 + $0x8] sm:$0xff] (%p267_p11), %v1256_v1  ;;  %v1258_v3 = vld [vmem:[#allocation3 + $0x18] sm:$0xff] (%p267_p11)   ;;  %v1259_v4 = vld [vmem:[#allocation3 + $0x20] sm:$0xff] (%p267_p11)  }
  0x72   : > { %s265_s26 = scalar_lea.vmem %s1893_s3, %s1700_s7  ;;  %339 = vst [vmem:[#allocation2 + $0x10] sm:$0xff] (%p267_p11), %v1257_v2  ;;  %340 = vst [vmem:[#allocation2 + $0x18] sm:$0xff] (%p267_p11), %v1258_v3  ;;  %v1260_v5 = vld [vmem:[#allocation3 + $0x28] sm:$0xff] (%p267_p11)   ;;  %v1261_v6 = vld [vmem:[#allocation3 + $0x30] sm:$0xff] (%p267_p11)  }
  0x73   : > { %341 = vst [vmem:[#allocation2 + $0x20] sm:$0xff] (%p267_p11), %v1259_v4  ;;  %342 = vst [vmem:[#allocation2 + $0x28] sm:$0xff] (%p267_p11), %v1260_v5  ;;  %v1262_v7 = vld [vmem:[#allocation3 + $0x38] sm:$0xff] (%p267_p11)  }
  0x74   : > { %343 = vst [vmem:[#allocation2 + $0x30] sm:$0xff] (%p267_p11), %v1261_v6  ;;  %344 = vst [vmem:[#allocation2 + $0x38] sm:$0xff] (%p267_p11), %v1262_v7 }
  0x78 PF: > { %p345_p0 = scmp.lt.s32.totalorder %s1477_s18, 0  ;;  %s346_s22 = ssub.s32 0, %s1477_s18  ;;  %v1263_v8 = vld [vmem:[#allocation6] sm:$0xff]   ;;  %v1265_v18 = vld [vmem:[#allocation6 + $0x8] sm:$0xff]   ;;  %v1267_v20 = vld [vmem:[#allocation6 + $0x10] sm:$0xff]  }
  0x79   : > { %s989_s28 = smin.u32 %s1477_s18, %s346_s22  ;;  %v1264_v9 = vld [vmem:[#allocation6 + $0x20] sm:$0xff]   ;;  %1088 = vmatprep.mubr.bf16.mxu0 %v1263_v8  ;;  %v1266_v19 = vld [vmem:[#allocation6 + $0x28] sm:$0xff]   ;;  %v1268_v21 = vld [vmem:[#allocation6 + $0x30] sm:$0xff]   ;;  %p1003_p10 = scmp.ne.s32.totalorder %s1477_s18, 3 }
  0x7a   : > { %s348_s29 = sand.u32 1, %s989_s28   ;;  %1096 = vmatprep.mubr.bf16.mxu1 %v1264_v9  ;;  %v1269_v22 = vld [vmem:[#allocation6 + $0x18] sm:$0xff]   ;;  %v994_v24 = vld [vmem:[%s265_s26] ss:$0 sm:$0xff] }
  0x7b   : > { %s349_s24 = ssub.s32 0, %s348_s29  ;;  %v1270_v23 = vld [vmem:[#allocation6 + $0x38] sm:$0xff]  }
  0x7c   : > { %s1918_s24 = smov (!%p345_p0, %s349_s24), %s348_s29 }
  0x7d   : > { %p991_p3 = scmp.lt.s32.totalorder %s1918_s24, 0  ;;  %s355_s30 = sadd.s32 2, %s1918_s24 }
  0x7f   : > { %s1920_s30 = smov (!%p991_p3, %s355_s30), %s1918_s24 }
  0x80   : > { %s992_s13 = sshll.u32 %s1920_s30, 7 }
  0x81   : > { %s374_s14 = sshra.s32 %s992_s13, 4 }
  0x82   : > { %s993_s5 = sshll.u32 %s374_s14, 3 }
  0x83   : > { %s1709_s15 = scalar_lea.vmem [#allocation2], %s993_s5 }
  0x84   : > { %v378_v10 = vld [vmem:[%s1709_s15] sm:$0xff]  ;;  %v379_v11 = vld [vmem:[%s1709_s15 + $0x8] sm:$0xff]  ;;  %v380_v12 = vld [vmem:[%s1709_s15 + $0x10] sm:$0xff] }
  0x85   : > { %1072 = vmatprep.subr.bf16.mxu0 %v378_v10  ;;  %1136 = vmatprep.subr.bf16.mxu1 %v378_v10  ;;  %v381_v13 = vld [vmem:[%s1709_s15 + $0x18] sm:$0xff]  ;;  %v382_v14 = vld [vmem:[%s1709_s15 + $0x20] sm:$0xff]  ;;  %v383_v15 = vld [vmem:[%s1709_s15 + $0x28] sm:$0xff] }
  0x86   : > { %1073 = vmatpush3.bf16.msra.mxu0 %v378_v10  ;;  %1144 = vmatpush3.bf16.msra.mxu1 %v378_v10  ;;  %v384_v16 = vld [vmem:[%s1709_s15 + $0x30] sm:$0xff]  ;;  %v385_v17 = vld [vmem:[%s1709_s15 + $0x38] sm:$0xff] }
  0x87   : > { %1074 = vmatprep.subr.bf16.mxu0 %v379_v11  ;;  %1137 = vmatprep.subr.bf16.mxu1 %v379_v11 }
  0x8a   : > { %1075 = vmatpush3.bf16.msra.mxu0 %v379_v11  ;;  %1145 = vmatpush3.bf16.msra.mxu1 %v379_v11 }
  0x8b   : > { %1076 = vmatprep.subr.bf16.mxu0 %v380_v12  ;;  %1138 = vmatprep.subr.bf16.mxu1 %v380_v12 }
  0x8e   : > { %1077 = vmatpush3.bf16.msra.mxu0 %v380_v12  ;;  %1146 = vmatpush3.bf16.msra.mxu1 %v380_v12 }
  0x8f   : > { %1078 = vmatprep.subr.bf16.mxu0 %v381_v13  ;;  %1139 = vmatprep.subr.bf16.mxu1 %v381_v13 }
  0x92   : > { %1079 = vmatpush3.bf16.msra.mxu0 %v381_v13  ;;  %1147 = vmatpush3.bf16.msra.mxu1 %v381_v13 }
  0x93   : > { %1080 = vmatprep.subr.bf16.mxu0 %v382_v14  ;;  %1140 = vmatprep.subr.bf16.mxu1 %v382_v14 }
  0x96   : > { %1081 = vmatpush3.bf16.msra.mxu0 %v382_v14  ;;  %1148 = vmatpush3.bf16.msra.mxu1 %v382_v14 }
  0x97   : > { %1082 = vmatprep.subr.bf16.mxu0 %v383_v15  ;;  %1141 = vmatprep.subr.bf16.mxu1 %v383_v15 }
  0x9a   : > { %1083 = vmatpush3.bf16.msra.mxu0 %v383_v15  ;;  %1149 = vmatpush3.bf16.msra.mxu1 %v383_v15 }
  0x9b   : > { %1084 = vmatprep.subr.bf16.mxu0 %v384_v16  ;;  %1142 = vmatprep.subr.bf16.mxu1 %v384_v16 }
  0x9e   : > { %1085 = vmatpush3.bf16.msra.mxu0 %v384_v16  ;;  %1150 = vmatpush3.bf16.msra.mxu1 %v384_v16 }
  0x9f   : > { %1086 = vmatprep.subr.bf16.mxu0 %v385_v17  ;;  %1143 = vmatprep.subr.bf16.mxu1 %v385_v17 }
  0xa2   : > { %1087 = vmatpush3.bf16.msra.mxu0 %v385_v17  ;;  %1151 = vmatpush3.bf16.msra.mxu1 %v385_v17 }
  0xa5   : > { %1089 = vmatmul.mubr.bf16.vlgmr.msra.gmra.mrb[0].mxu0 %v1265_v18  ;;  %1097 = vmatmul.mubr.bf16.vlgmr.msra.gmra.mrb[0].mxu1 %v1266_v19 }
  0xa6   : > { %1092 = vmatprep.mubr.bf16.mxu0 %v1267_v20  ;;  %1100 = vmatprep.mubr.bf16.mxu1 %v1268_v21 }
  0xad   : > { %1093 = vmatmul.mubr.bf16.gmra.mrb[4].mxu0 %v1269_v22  ;;  %1101 = vmatmul.mubr.bf16.gmra.mrb[4].mxu1 %v1270_v23 }
 0x178   : > { %v1090_v25 = vpop.f32.mrb[0].mxu0  ;;  %v1098_v26 = vpop.f32.mrb[0].mxu1 }
 0x179   : > { %v1724_v27 = vadd.f32 %v1090_v25, %v994_v24  ;;  %v1726_v28 = vadd.f32 %v1098_v26, %v994_v24  ;;  %v475_v29 = vpop.f32.mrb[1].mxu0  ;;  %v507_v30 = vpop.f32.mrb[1].mxu1 }
 0x17a   : > { %v1728_v31 = vadd.f32 %v994_v24, %v475_v29  ;;  %v1730_v32 = vadd.f32 %v994_v24, %v507_v30  ;;  %v1091_v33 = vpop.f32.mrb[2].mxu0  ;;  %v1099_v34 = vpop.f32.mrb[2].mxu1 }
 0x17b   : > { %v1732_v35 = vadd.f32 %v1091_v33, %v994_v24  ;;  %v1734_v36 = vadd.f32 %v1099_v34, %v994_v24  ;;  %v478_v37 = vpop.f32.mrb[3].mxu0  ;;  %v510_v38 = vpop.f32.mrb[3].mxu1  ;;  %546 = vst [vmem:[#allocation9 + $0x10] sm:$0xff] (!%p1003_p10), %v1724_v27  ;;  %554 = vst [vmem:[#allocation9 + $0x50] sm:$0xff] (!%p1003_p10), %v1726_v28 }
 0x17c   : > { %v1736_v39 = vadd.f32 %v994_v24, %v478_v37  ;;  %v1738_v40 = vadd.f32 %v994_v24, %v510_v38  ;;  %544 = vst [vmem:[#allocation9] sm:$0xff] (!%p1003_p10), %v1728_v31  ;;  %552 = vst [vmem:[#allocation9 + $0x40] sm:$0xff] (!%p1003_p10), %v1730_v32 }
 0x17d   : > { %547 = vst [vmem:[#allocation9 + $0x18] sm:$0xff] (!%p1003_p10), %v1732_v35  ;;  %555 = vst [vmem:[#allocation9 + $0x58] sm:$0xff] (!%p1003_p10), %v1734_v36 }
 0x17e   : > { %542 = sbr.rel (%p1003_p10) target bundleno = 391 (0x187), region = 56  ;;  %545 = vst [vmem:[#allocation9 + $0x8] sm:$0xff] (!%p1003_p10), %v1736_v39  ;;  %553 = vst [vmem:[#allocation9 + $0x48] sm:$0xff] (!%p1003_p10), %v1738_v40 }
 0x180   : > { %v1094_v41 = vpop.f32.mrb[4].mxu0  ;;  %v1102_v42 = vpop.f32.mrb[4].mxu1 }
 0x181   : > { %v1740_v43 = vadd.f32 %v1094_v41, %v994_v24  ;;  %v1742_v44 = vadd.f32 %v1102_v42, %v994_v24  ;;  %v491_v45 = vpop.f32.mrb[5].mxu0  ;;  %v523_v46 = vpop.f32.mrb[5].mxu1 }
 0x182   : > { %v1744_v47 = vadd.f32 %v994_v24, %v491_v45  ;;  %v1746_v48 = vadd.f32 %v994_v24, %v523_v46  ;;  %v1095_v49 = vpop.f32.mrb[6].mxu0  ;;  %v1103_v50 = vpop.f32.mrb[6].mxu1 }
 0x183   : > { %v1748_v51 = vadd.f32 %v1095_v49, %v994_v24  ;;  %v1750_v52 = vadd.f32 %v1103_v50, %v994_v24  ;;  %v494_v53 = vpop.f32.mrb[7].mxu0  ;;  %v526_v54 = vpop.f32.mrb[7].mxu1  ;;  %550 = vst [vmem:[#allocation9 + $0x30] sm:$0xff] (!%p1003_p10), %v1740_v43  ;;  %558 = vst [vmem:[#allocation9 + $0x70] sm:$0xff] (!%p1003_p10), %v1742_v44 }
 0x184   : > { %v1752_v55 = vadd.f32 %v994_v24, %v494_v53  ;;  %v1754_v56 = vadd.f32 %v994_v24, %v526_v54  ;;  %548 = vst [vmem:[#allocation9 + $0x20] sm:$0xff] (!%p1003_p10), %v1744_v47  ;;  %556 = vst [vmem:[#allocation9 + $0x60] sm:$0xff] (!%p1003_p10), %v1746_v48 }
 0x185   : > { %551 = vst [vmem:[#allocation9 + $0x38] sm:$0xff] %v1748_v51  ;;  %559 = vst [vmem:[#allocation9 + $0x78] sm:$0xff] %v1750_v52 }
 0x186   : > { %549 = vst [vmem:[#allocation9 + $0x28] sm:$0xff] %v1752_v55  ;;  %557 = vst [vmem:[#allocation9 + $0x68] sm:$0xff] %v1754_v56 }
 0x187 PF: > { %p1004_p12 = scmp.eq.s32.totalorder %s1477_s18, 3 }
 0x188   : > { %v1271_v57 = vld [vmem:[%s1691_s6] sm:$0xff] (!%p1004_p12)   ;;  %v1272_v58 = vld [vmem:[%s1691_s6 + $0x8] sm:$0xff] (!%p1004_p12)   ;;  %v1273_v59 = vld [vmem:[%s1691_s6 + $0x10] sm:$0xff] (!%p1004_p12)   ;;  %v580_v60 = vmin.f32 (!%p1004_p12), %v1728_v31, 0.0  ;;  %v581_v61 = vmin.f32 (!%p1004_p12), %v1736_v39, 0.0  ;;  %v588_v62 = vmin.f32 (!%p1004_p12), %v1730_v32, 0.0 }
 0x189   : > { %563 = sbr.rel (%p1004_p12) target bundleno = 651 (0x28b), region = 60  ;;  %1104 = vmatprep.subr.bf16.mxu0 (!%p1004_p12), %v1271_v57  ;;  %1152 = vmatprep.subr.bf16.mxu1 (!%p1004_p12), %v1271_v57  ;;  %v1274_v63 = vld [vmem:[%s1691_s6 + $0x18] sm:$0xff] (!%p1004_p12)   ;;  %v589_v0 = vmin.f32 (!%p1004_p12), %v1738_v40, 0.0  ;;  %v582_v5 = vmin.f32 (!%p1004_p12), %v1724_v27, 0.0  ;;  %v583_v6 = vmin.f32 (!%p1004_p12), %v1732_v35, 0.0  ;;  %v590_v8 = vmin.f32 (!%p1004_p12), %v1726_v28, 0.0 }
 0x18a   : > { %1105 = vmatpush3.bf16.msra.mxu0 (!%p1004_p12), %v1271_v57  ;;  %1160 = vmatpush3.bf16.msra.mxu1 (!%p1004_p12), %v1271_v57  ;;  %v596_v1 = vmul.f32 (!%p1004_p12), 1.442695, %v580_v60  ;;  %v598_v2 = vmul.f32 (!%p1004_p12), 1.442695, %v581_v61  ;;  %v612_v3 = vmul.f32 (!%p1004_p12), 1.442695, %v588_v62 }
 0x18b   : > { %1106 = vmatprep.subr.bf16.mxu0 (!%p1004_p12), %v1272_v58  ;;  %1153 = vmatprep.subr.bf16.mxu1 (!%p1004_p12), %v1272_v58  ;;  %v614_v4 = vmul.f32 (!%p1004_p12), 1.442695, %v589_v0  ;;  %v600_v7 = vmul.f32 (!%p1004_p12), 1.442695, %v582_v5  ;;  %v591_v9 = vmin.f32 (!%p1004_p12), %v1734_v36, 0.0  ;;  %v1275_v10 = vld [vmem:[%s1691_s6 + $0x20] sm:$0xff] (!%p1004_p12)  }
 0x18c   : > { %1279 = vpow2.f32 (!%p1004_p12), %v596_v1  ;;  %v602_v11 = vmul.f32 (!%p1004_p12), 1.442695, %v583_v6  ;;  %v616_v12 = vmul.f32 (!%p1004_p12), 1.442695, %v590_v8  ;;  %v584_v14 = vmin.f32 (!%p1004_p12), %v1744_v47, 0.0  ;;  %v1276_v19 = vld [vmem:[%s1691_s6 + $0x28] sm:$0xff] (!%p1004_p12)  }
 0x18d   : > { %1281 = vpow2.f32 (!%p1004_p12), %v598_v2  ;;  %v618_v13 = vmul.f32 (!%p1004_p12), 1.442695, %v591_v9  ;;  %v585_v15 = vmin.f32 (!%p1004_p12), %v1752_v55, 0.0  ;;  %v592_v17 = vmin.f32 (!%p1004_p12), %v1746_v48, 0.0  ;;  %v1277_v33 = vld [vmem:[%s1691_s6 + $0x30] sm:$0xff] (!%p1004_p12)   ;;  %v1278_v57 = vld [vmem:[%s1691_s6 + $0x38] sm:$0xff] (!%p1004_p12)  }
 0x18e   : > { %1107 = vmatpush3.bf16.msra.mxu0 (!%p1004_p12), %v1272_v58  ;;  %1161 = vmatpush3.bf16.msra.mxu1 (!%p1004_p12), %v1272_v58  ;;  %1283 = vpow2.f32 (!%p1004_p12), %v612_v3  ;;  %v604_v16 = vmul.f32 (!%p1004_p12), 1.442695, %v584_v14  ;;  %v593_v18 = vmin.f32 (!%p1004_p12), %v1754_v56, 0.0  ;;  %v586_v23 = vmin.f32 (!%p1004_p12), %v1740_v43, 0.0  ;;  %s660_s11 = sadd.s32 (!%p1004_p12), 1, %s1477_s18 }
 0x18f   : > { %1108 = vmatprep.subr.bf16.mxu0 (!%p1004_p12), %v1273_v59  ;;  %1154 = vmatprep.subr.bf16.mxu1 (!%p1004_p12), %v1273_v59  ;;  %1285 = vpow2.f32 (!%p1004_p12), %v614_v4  ;;  %v606_v20 = vmul.f32 (!%p1004_p12), 1.442695, %v585_v15  ;;  %v620_v21 = vmul.f32 (!%p1004_p12), 1.442695, %v592_v17  ;;  %v587_v24 = vmin.f32 (!%p1004_p12), %v1748_v51, 0.0  ;;  %s662_s23 = ssub.s32 (!%p1004_p12), 0, %s660_s11 }
 0x190   : > { %1287 = vpow2.f32 %v600_v7  ;;  %v622_v22 = vmul.f32 1.442695, %v593_v18  ;;  %v608_v25 = vmul.f32 1.442695, %v586_v23  ;;  %v594_v26 = vmin.f32 %v1742_v44, 0.0  ;;  %s1021_s6 = smin.u32 %s662_s23, %s660_s11  ;;  %p661_p1 = scmp.lt.s32.totalorder %s660_s11, 0 }
 0x191   : > { %1289 = vpow2.f32 %v602_v11  ;;  %v595_v29 = vmin.f32 %v1750_v52, 0.0  ;;  %vm564_vm0 = vcmp.gt.f32.partialorder %v1728_v31, 0.0  ;;  %vm565_vm1 = vcmp.gt.f32.partialorder %v1736_v39, 0.0  ;;  %s664_s7 = sand.u32 1, %s1021_s6  }
 0x192   : > { %1109 = vmatpush3.bf16.msra.mxu0 %v1273_v59  ;;  %1162 = vmatpush3.bf16.msra.mxu1 %v1273_v59  ;;  %1291 = vpow2.f32 %v616_v12  ;;  %v610_v34 = vmul.f32 1.442695, %v587_v24  ;;  %v624_v41 = vmul.f32 1.442695, %v594_v26  ;;  %vm572_vm2 = vcmp.gt.f32.partialorder %v1730_v32, 0.0  ;;  %s665_s8 = ssub.s32 0, %s664_s7 }
 0x193   : > { %1110 = vmatprep.subr.bf16.mxu0 %v1274_v63  ;;  %1155 = vmatprep.subr.bf16.mxu1 %v1274_v63  ;;  %1293 = vpow2.f32 %v618_v13  ;;  %v626_v42 = vmul.f32 1.442695, %v595_v29  ;;  %vm573_vm3 = vcmp.gt.f32.partialorder %v1738_v40, 0.0  ;;  %vm566_vm4 = vcmp.gt.f32.partialorder %v1724_v27, 0.0  ;;  %s1922_s8 = smov (!%p661_p1, %s665_s8), %s664_s7 }
 0x194   : > { %1295 = vpow2.f32 %v604_v16  ;;  %vm567_vm5 = vcmp.gt.f32.partialorder %v1732_v35, 0.0  ;;  %vm574_vm6 = vcmp.gt.f32.partialorder %v1726_v28, 0.0  ;;  %vm575_vm7 = vcmp.gt.f32.partialorder %v1734_v36, 0.0  ;;  %p1023_p2 = scmp.lt.s32.totalorder %s1922_s8, 0  ;;  %s671_s9 = sadd.s32 2, %s1922_s8 }
 0x195   : > { %1297 = vpow2.f32 %v606_v20  ;;  %vm568_vm8 = vcmp.gt.f32.partialorder %v1744_v47, 0.0  ;;  %vm569_vm9 = vcmp.gt.f32.partialorder %v1752_v55, 0.0  ;;  %vm576_vm10 = vcmp.gt.f32.partialorder %v1746_v48, 0.0 }
 0x196   : > { %1111 = vmatpush3.bf16.msra.mxu0 %v1274_v63  ;;  %1163 = vmatpush3.bf16.msra.mxu1 %v1274_v63  ;;  %v1280_v30 = vpop.eup %1279  ;;  %1299 = vpow2.f32 %v620_v21  ;;  %vm577_vm11 = vcmp.gt.f32.partialorder %v1754_v56, 0.0  ;;  %vm570_vm12 = vcmp.gt.f32.partialorder %v1740_v43, 0.0  ;;  %vm571_vm13 = vcmp.gt.f32.partialorder %v1748_v51, 0.0  ;;  %s1924_s9 = smov (!%p1023_p2, %s671_s9), %s1922_s8 }
 0x197   : > { %1112 = vmatprep.subr.bf16.mxu0 %v1275_v10  ;;  %1156 = vmatprep.subr.bf16.mxu1 %v1275_v10  ;;  %v1282_v37 = vpop.eup %1281  ;;  %v1005_v38 = vadd.f32 -1.0, %v1280_v30  ;;  %1301 = vpow2.f32 %v622_v22  ;;  %vm578_vm14 = vcmp.gt.f32.partialorder %v1742_v44, 0.0  ;;  %vm579_vm15 = vcmp.gt.f32.partialorder %v1750_v52, 0.0  ;;  %s1024_s26 = sshll.u32 %s1924_s9, 7 }
 0x198   : > { %v1284_v45 = vpop.eup %1283  ;;  %v1006_v46 = vadd.f32 -1.0, %v1282_v37  ;;  %1303 = vpow2.f32 %v608_v25  ;;  %s852_s22 = sshra.s32 %s1024_s26, 4 }
 0x199   : > { %v1286_v49 = vpop.eup %1285  ;;  %v644_v50 = vsel %vm564_vm0, %v1728_v31, %v1005_v38  ;;  %v1013_v53 = vadd.f32 -1.0, %v1284_v45  ;;  %1305 = vpow2.f32 %v610_v34  ;;  %s1033_s28 = sshll.u32 %s852_s22, 3 }
 0x19a   : > { %1113 = vmatpush3.bf16.msra.mxu0 %v1275_v10  ;;  %1164 = vmatpush3.bf16.msra.mxu1 %v1275_v10  ;;  %v1288_v54 = vpop.eup %1287  ;;  %v645_v58 = vsel %vm565_vm1, %v1736_v39, %v1006_v46  ;;  %v1014_v59 = vadd.f32 -1.0, %v1286_v49  ;;  %1307 = vpow2.f32 %v624_v41  ;;  %s855_s18 = scalar_lea.vmem [#allocation2], %s1033_s28 }
 0x19b   : > { %1114 = vmatprep.subr.bf16.mxu0 %v1276_v19  ;;  %1157 = vmatprep.subr.bf16.mxu1 %v1276_v19  ;;  %v1290_v60 = vpop.eup %1289  ;;  %v675_v61 = vpack.c.bf16 %v645_v58, %v644_v50  ;;  %v652_v31 = vsel %vm572_vm2, %v1730_v32, %v1013_v53  ;;  %v1007_v62 = vadd.f32 -1.0, %v1288_v54  ;;  %1309 = vpow2.f32 %v626_v42 }
 0x19c   : > { %v1292_v63 = vpop.eup %1291  ;;  %v653_v0 = vsel %vm573_vm3, %v1738_v40, %v1014_v59  ;;  %v1008_v1 = vadd.f32 -1.0, %v1290_v60 }
 0x19d   : > { %v1294_v39 = vpop.eup %1293  ;;  %v679_v2 = vpack.c.bf16 %v653_v0, %v652_v31  ;;  %v646_v3 = vsel %vm566_vm4, %v1724_v27, %v1007_v62  ;;  %v1015_v32 = vadd.f32 -1.0, %v1292_v63  ;;  %1120 = vmatprep.mubr.bf16.mxu0 %v675_v61 }
 0x19e   : > { %1115 = vmatpush3.bf16.msra.mxu0 %v1276_v19  ;;  %1165 = vmatpush3.bf16.msra.mxu1 %v1276_v19  ;;  %v1296_v4 = vpop.eup %1295  ;;  %v647_v40 = vsel %vm567_vm5, %v1732_v35, %v1008_v1  ;;  %v1016_v5 = vadd.f32 -1.0, %v1294_v39 }
 0x19f   : > { %1116 = vmatprep.subr.bf16.mxu0 %v1277_v33  ;;  %1158 = vmatprep.subr.bf16.mxu1 %v1277_v33  ;;  %v1298_v6 = vpop.eup %1297  ;;  %v654_v27 = vsel %vm574_vm6, %v1726_v28, %v1015_v32  ;;  %v1009_v7 = vadd.f32 -1.0, %v1296_v4  ;;  %v676_v9 = vpack.c.bf16 %v647_v40, %v646_v3 }
 0x1a0   : > { %1128 = vmatprep.mubr.bf16.mxu1 %v679_v2  ;;  %v1300_v8 = vpop.eup %1299  ;;  %v655_v10 = vsel %vm575_vm7, %v1734_v36, %v1016_v5  ;;  %v1010_v35 = vadd.f32 -1.0, %v1298_v6 }
 0x1a1   : > { %v1302_v11 = vpop.eup %1301  ;;  %v680_v12 = vpack.c.bf16 %v655_v10, %v654_v27  ;;  %v648_v28 = vsel %vm568_vm8, %v1744_v47, %v1009_v7  ;;  %v1017_v13 = vadd.f32 -1.0, %v1300_v8 }
 0x1a2   : > { %1117 = vmatpush3.bf16.msra.mxu0 %v1277_v33  ;;  %1166 = vmatpush3.bf16.msra.mxu1 %v1277_v33  ;;  %v1304_v14 = vpop.eup %1303  ;;  %v649_v15 = vsel %vm569_vm9, %v1752_v55, %v1010_v35  ;;  %v1018_v16 = vadd.f32 -1.0, %v1302_v11 }
 0x1a3   : > { %1118 = vmatprep.subr.bf16.mxu0 %v1278_v57  ;;  %1159 = vmatprep.subr.bf16.mxu1 %v1278_v57  ;;  %v1306_v36 = vpop.eup %1305  ;;  %v677_v17 = vpack.c.bf16 %v649_v15, %v648_v28  ;;  %v656_v18 = vsel %vm576_vm10, %v1746_v48, %v1017_v13  ;;  %v1011_v19 = vadd.f32 -1.0, %v1304_v14 }
 0x1a4   : > { %v1308_v20 = vpop.eup %1307  ;;  %v657_v47 = vsel %vm577_vm11, %v1754_v56, %v1018_v16  ;;  %v1012_v21 = vadd.f32 -1.0, %v1306_v36 }
 0x1a5   : > { %v1310_v55 = vpop.eup %1309  ;;  %v681_v22 = vpack.c.bf16 %v657_v47, %v656_v18  ;;  %v650_v23 = vsel %vm570_vm12, %v1740_v43, %v1011_v19  ;;  %v1019_v48 = vadd.f32 -1.0, %v1308_v20 }
 0x1a6   : > { %1119 = vmatpush3.bf16.msra.mxu0 %v1278_v57  ;;  %1167 = vmatpush3.bf16.msra.mxu1 %v1278_v57  ;;  %v651_v24 = vsel %vm571_vm13, %v1748_v51, %v1012_v21  ;;  %v1020_v25 = vadd.f32 -1.0, %v1310_v55 }
 0x1a7   : > { %v658_v26 = vsel %vm578_vm14, %v1742_v44, %v1019_v48  ;;  %v678_v29 = vpack.c.bf16 %v651_v24, %v650_v23 }
 0x1a8   : > { %v659_v56 = vsel %vm579_vm15, %v1750_v52, %v1020_v25 }
 0x1a9   : > { %1121 = vmatmul.mubr.bf16.vlgmr.msra.gmra.mrb[0].mxu0 %v676_v9  ;;  %1129 = vmatmul.mubr.bf16.vlgmr.msra.gmra.mrb[0].mxu1 %v680_v12  ;;  %v682_v30 = vpack.c.bf16 %v659_v56, %v658_v26 }
 0x1aa   : > { %1124 = vmatprep.mubr.bf16.mxu0 %v677_v17  ;;  %1132 = vmatprep.mubr.bf16.mxu1 %v681_v22 }
 0x1b1   : > { %1125 = vmatmul.mubr.bf16.gmra.mrb[4].mxu0 %v678_v29  ;;  %1133 = vmatmul.mubr.bf16.gmra.mrb[4].mxu1 %v682_v30 }
 0x27c   : > { %v1122_v43 = vpop.f32.mrb[0].mxu0  ;;  %v1130_v44 = vpop.f32.mrb[0].mxu1 }
 0x27d   : > { %v781_v51 = vpop.f32.mrb[1].mxu0  ;;  %v813_v52 = vpop.f32.mrb[1].mxu1 }
 0x27e   : > { %v1123_v33 = vpop.f32.mrb[2].mxu0  ;;  %v1131_v34 = vpop.f32.mrb[2].mxu1 }
 0x27f   : > { %v845_v37 = vpack.c.bf16 %v1123_v33, %v1122_v43  ;;  %v849_v38 = vpack.c.bf16 %v1131_v34, %v1130_v44  ;;  %v784_v41 = vpop.f32.mrb[3].mxu0  ;;  %v816_v42 = vpop.f32.mrb[3].mxu1 }
 0x280   : > { %v844_v45 = vpack.c.bf16 %v784_v41, %v781_v51  ;;  %v848_v46 = vpack.c.bf16 %v816_v42, %v813_v52 }
 0x281   : > { %857 = vst [vmem:[%s855_s18 + $0x8] sm:$0xff] %v845_v37  ;;  %861 = vst [vmem:[%s855_s18 + $0x28] sm:$0xff] %v849_v38 }
 0x282   : > { %856 = vst [vmem:[%s855_s18] sm:$0xff] %v844_v45  ;;  %860 = vst [vmem:[%s855_s18 + $0x20] sm:$0xff] %v848_v46 }
 0x284   : > { %v1126_v49 = vpop.f32.mrb[4].mxu0  ;;  %v1134_v50 = vpop.f32.mrb[4].mxu1 }
 0x285   : > { %v797_v53 = vpop.f32.mrb[5].mxu0  ;;  %v829_v54 = vpop.f32.mrb[5].mxu1 }
 0x286   : > { %v1127_v57 = vpop.f32.mrb[6].mxu0  ;;  %v1135_v58 = vpop.f32.mrb[6].mxu1 }
 0x287   : > { %v847_v59 = vpack.c.bf16 %v1127_v57, %v1126_v49  ;;  %v851_v60 = vpack.c.bf16 %v1135_v58, %v1134_v50  ;;  %v800_v61 = vpop.f32.mrb[7].mxu0  ;;  %v832_v31 = vpop.f32.mrb[7].mxu1 }
 0x288   : > { %v846_v62 = vpack.c.bf16 %v800_v61, %v797_v53  ;;  %v850_v63 = vpack.c.bf16 %v832_v31, %v829_v54 }
 0x289   : > { %859 = vst [vmem:[%s855_s18 + $0x18] sm:$0xff] %v847_v59  ;;  %863 = vst [vmem:[%s855_s18 + $0x38] sm:$0xff] %v851_v60 }
 0x28a   : > { %858 = vst [vmem:[%s855_s18 + $0x10] sm:$0xff] %v846_v62  ;;  %862 = vst [vmem:[%s855_s18 + $0x30] sm:$0xff] %v850_v63 }
 0x28b PF: > { %p1198_p8 = scmp.eq.s32.totalorder %s1549_s21, 3  ;;  %s1492_s29 = smov [#allocation9]  }
 0x28c   : > { %s870_s24 = sshll.u32 %s1492_s29, 4  ;;  %s871_s24 = int_to_ptr.vmem [resolvable:$true] %s870_s24 }
 0x28d   : > { %s1397_s30 = scalar_lea.vmem %s871_s24, 2048  ;;  %p1404_p6 = scmp.lt.s32.totalorder %s871_s24, %s871_s24 }
 0x28e   : > { %p1398_p13 = scmp.ne.s32.totalorder %s871_s24, %s1397_s30  ;;  %p1405_p7 = scmp.lt.s32.totalorder %s1397_s30, %s1397_s30 }
 0x290   : > { %p1399_p4 = pnand %p1398_p13, %p1198_p8  ;;  %p1406_p9 = por %p1405_p7, %p1404_p6 }
 0x292   : > { %p1400_p5 = pneg %p1399_p4 }
 0x294   : > { %p1407_p11 = pnand %p1406_p9, %p1400_p5 }
 0x296   : > { %1410 = shalt.err (!%p1407_p11)
}
 0x297   : > { %s1411_s5 = scalar_lea.hbm %s1894_s4, 2048 }
 0x298   : > { %p1412_p0 = scmp.ne.s32.totalorder %s1894_s4, %s1411_s5  ;;  %p1417_p12 = scmp.lt.u32.totalorder %s1411_s5, %s1894_s4 }
 0x29a   : > { %p1413_p3 = pnand %p1412_p0, %p1198_p8 }
 0x29c   : > { %p1414_p10 = pneg %p1413_p3 }
 0x29e   : > { %p1419_p1 = pnand %p1417_p12, %p1414_p10 }
 0x2a0   : > { %1422 = shalt.err (!%p1419_p1)
}
 0x2a1   : > { %s1493_s23 = smov 128   ;;  %s1494_s6 = smov 8  }
 0x2a2   : > { %1179 = dma.vmem_to_hbm [thread:$0]  (%p1198_p8), %s871_s24, 2048, %s1894_s4, [#allocation5], %s1493_s23, %s1493_s23, %s1494_s6  }
 0x2a3   : > { %1460 = dma.done.wait (%p1198_p8), [#allocation5], 2048  }
 0x2a4   : > { %1462 = vsyncadd (%p1198_p8), [#allocation5], 4294965248 }
 0x2a5 PF: > { %s17_s20 = sadd.s32 1, %s1485_s20   ;;  %s1910_s15 = smov %s1469_s16 }
 0x2a6   : > { %p14_p2 = scmp.ge.s32.totalorder %s17_s20, 6   ;;  %s1911_s16 = smov %s1473_s17 }
 0x2a7   : > { %s1912_s17 = smov %s1644_s25  ;;  %s1913_s18 = smov %s1481_s19 }
 0x2a8   : > { %s1914_s19 = smov %s1916_s12  ;;  %16 = sbr.rel (!%p14_p2) target bundleno = 5 (0x5), region = 99 }
 0x2af   :  { %886 = vsyncpa [#allocation4], 1 }
 0x2b0   :  { %888 = vsyncpa [#allocation4 + $0x1], 1 }
 0x2b1   :  { %889 = vsyncpa [#allocation7], 1 }
 0x2b2   :  { %890 = vsyncpa [#allocation5], 1 }
 0x2b3   :  { %892 = vsyncpa [#allocation5 + $0x1], 1 }

// kernel: tpu_custom_call.1
= control target key start
LH: loop header
LB: loop body
LE: loop exit
PB: predicated region body
PF: predicated region fallthrough
CT: control target
= control target key end

     0   :  { %9 = vsyncpa [#allocation4], 0  ;;  %s1890_s0 = inlined_call_operand.hbm [shape: bf16[128,128], index: 0, kind: input, shape index: {}]   ;;  %s1891_s1 = inlined_call_operand.hbm [shape: bf16[128,128], index: 1, kind: input, shape index: {}]   ;;  %s1892_s2 = inlined_call_operand.hbm [shape: bf16[4,128,128], index: 2, kind: input, shape index: {}]   ;;  %s1893_s3 = inlined_call_operand.vmem [shape: f32[4,1,128], index: 3, kind: input, shape index: {}]   ;;  %s1894_s4 = inlined_call_operand.hbm [shape: f32[128,128], index: 4, kind: output, shape index: {}]  }
   0x1   :  { %10 = vsyncpa [#allocation7], 0 }
   0x2   :  { %11 = vsyncpa [#allocation5], 0  ;;  %s1520_s15 = smov 0   ;;  %s1522_s16 = smov 0  }
   0x3   :  { %s1524_s17 = smov 0   ;;  %s1526_s18 = smov 0  }
   0x4   :  { %s1528_s19 = smov 0   ;;  %s1530_s20 = smov 0  }
   0x5 LB: > { %s1549_s21 = sadd.s32 4294967295, %s1485_s20   ;;  %p90_p0 = scmp.ne.s32.totalorder %s1473_s17, %s1469_s16  ;;  %s1485_s20 = sphi %s1530_s20, %s17_s20   ;;  %s1481_s19 = sphi %s1528_s19, %s1914_s19   ;;  %s1477_s18 = sphi %s1526_s18, %s1913_s18   ;;  %s1473_s17 = sphi %s1524_s17, %s1912_s17   ;;  %s1469_s16 = sphi %s1522_s16, %s1911_s16   ;;  %s1465_s15 = sphi %s1520_s15, %s1910_s15  }
   0x6   : > { %p91_p1 = scmp.eq.s32.totalorder %s1485_s20, 0  ;;  %p96_p2 = scmp.ne.s32.totalorder %s1469_s16, %s1465_s15 }
   0x7   : > { %p1895_p3 = scmp.eq.s32.totalorder %s1549_s21, 0  ;;  %p969_p4 = scmp.ge.s32.totalorder %s1485_s20, 1 }
   0x8   : > { %p92_p5 = por %p91_p1, %p90_p0  ;;  %p154_p6 = scmp.lt.s32.totalorder %s1485_s20, 5 }
   0x9   : > { %p1560_p7 = por %p1895_p3, %p96_p2  ;;  %s1487_s24 = smov [#allocation3]  }
   0xa   : > { %p1564_p8 = pnand %p969_p4, %p154_p6  ;;  %s166_s25 = sshll.u32 %s1487_s24, 4  ;;  %s167_s25 = int_to_ptr.vmem [resolvable:$true] %s166_s25 }
   0xb   : > { %s1899_s22 = scalar_select %p1560_p7, 1, 0 }
   0xc   : > { %s1900_s23 = scalar_select %p1564_p8, 1, 0 }
   0xd   : > { %p1182_p9 = pneg %p1564_p8  ;;  %p1195_p11 = scmp.lt.s32.totalorder %s1485_s20, 4 }
   0xe   : > { %s1311_s30 = scalar_lea.hbm %s1890_s0, 1024 }
   0xf   : > { %p1572_p10 = pnand %p1182_p9, %p1895_p3  ;;  %p1577_p12 = pnand %p1195_p11, %p92_p5 }
  0x10   : > { %p1312_p13 = scmp.ne.s32.totalorder %s1890_s0, %s1311_s30  ;;  %p1318_p4 = scmp.lt.u32.totalorder %s1311_s30, %s1890_s0 }
  0x11   : > { %s1902_s27 = scalar_select %p1577_p12, 1, 0 }
  0x12   : > { %p1313_p0 = pneg %p1572_p10 }
  0x14   : > { %p1314_p1 = pnand %p1313_p0, %p1312_p13 }
  0x16   : > { %p1315_p2 = pneg %p1314_p1 }
  0x18   : > { %p1320_p5 = pnand %p1318_p4, %p1315_p2 }
  0x1a   : > { %1323 = shalt.err (!%p1320_p5)
}
  0x1b   : > { %s1324_s9 = scalar_lea.vmem %s167_s25, 1024  ;;  %p1332_p3 = scmp.lt.s32.totalorder %s167_s25, %s167_s25 }
  0x1c   : > { %p1325_p6 = scmp.ne.s32.totalorder %s167_s25, %s1324_s9  ;;  %p1333_p7 = scmp.lt.s32.totalorder %s1324_s9, %s1324_s9 }
  0x1e   : > { %p1327_p9 = pnand %p1325_p6, %p1313_p0  ;;  %p1334_p8 = por %p1333_p7, %p1332_p3 }
  0x20   : > { %p1328_p11 = pneg %p1327_p9 }
  0x22   : > { %p1335_p12 = pnand %p1334_p8, %p1328_p11 }
  0x24   : > { %1338 = shalt.err (!%p1335_p12)
}
  0x25   : > { %s1488_s10 = smov 64   ;;  %s1489_s11 = smov 4  }
  0x26   : > { %1185 = dma.hbm_to_vmem [thread:$0]  (!%p1572_p10), %s1890_s0, 1024, %s167_s25, [#allocation4], %s1488_s10, %s1488_s10, %s1489_s11  }
  0x27   : > { %s1490_s14 = smov [#allocation6]   ;;  %s1339_s29 = scalar_lea.hbm %s1891_s1, 1024 }
  0x28   : > { %s182_s15 = sshll.u32 %s1490_s14, 4  ;;  %p1340_p3 = scmp.ne.s32.totalorder %s1891_s1, %s1339_s29  ;;  %s183_s15 = int_to_ptr.vmem [resolvable:$true] %s182_s15 }
  0x29   : > { %p1346_p12 = scmp.lt.u32.totalorder %s1339_s29, %s1891_s1 }
  0x2a   : > { %p1342_p7 = pnand %p1340_p3, %p1313_p0 }
  0x2c   : > { %p1343_p8 = pneg %p1342_p7 }
  0x2e   : > { %p1348_p13 = pnand %p1346_p12, %p1343_p8 }
  0x30   : > { %1351 = shalt.err (!%p1348_p13)
}
  0x31   : > { %s1352_s25 = scalar_lea.vmem %s183_s15, 1024  ;;  %p1360_p5 = scmp.lt.s32.totalorder %s183_s15, %s183_s15 }
  0x32   : > { %p1353_p1 = scmp.ne.s32.totalorder %s183_s15, %s1352_s25  ;;  %p1361_p6 = scmp.lt.s32.totalorder %s1352_s25, %s1352_s25 }
  0x34   : > { %p1355_p2 = pnand %p1353_p1, %p1313_p0  ;;  %p1362_p9 = por %p1361_p6, %p1360_p5 }
  0x36   : > { %p1356_p4 = pneg %p1355_p2 }
  0x38   : > { %p1363_p11 = pnand %p1362_p9, %p1356_p4 }
  0x3a   : > { %1366 = shalt.err (!%p1363_p11)
}
  0x3b   : > { %1188 = dma.hbm_to_vmem [thread:$0]  (!%p1572_p10), %s1891_s1, 1024, %s183_s15, [#allocation7], %s1488_s10, %s1488_s10, %s1489_s11  }
  0x3c   : > { %s29_s12 = sadd.s32 1, %s1481_s19  ;;  %s83_s13 = sadd.s32 1, %s1473_s17 }
  0x3d   : > { %p31_p0 = scmp.ge.s32.totalorder %s29_s12, 4  ;;  %s196_s14 = sand.u32 1, %s1485_s20  }
  0x3e   : > { %s198_s26 = sand.u32 1, %s1473_s17   ;;  %s1038_s28 = sshll.u32 %s1481_s19, 10 }
  0x3f   : > { %s1916_s12 = smov (%p31_p0, %s29_s12), 0  ;;  %s973_s24 = sshll.u32 %s198_s26, 6 }
  0x40   : > { %s80_s29 = ssub.s32 %s1481_s19, %s1916_s12  ;;  %s1641_s6 = scalar_lea.hbm %s1892_s2, %s1038_s28 }
  0x41   : > { %p81_p3 = scmp.eq.s32.totalorder %s80_s29, 0  ;;  %s200_s15 = scalar_lea.vmem [#allocation8], %s973_s24 }
  0x42   : > { %s207_s7 = sshll.u32 %s200_s15, 4  ;;  %s1648_s8 = scalar_lea.sflag [#allocation4], %s196_s14  ;;  %s1646_s7 = int_to_ptr.vmem [resolvable:$true] %s207_s7 }
  0x43   : > { %s1644_s25 = scalar_select %p81_p3, %s1473_s17, %s83_s13  }
  0x44   : > { %s1367_s9 = scalar_lea.hbm %s1641_s6, 1024  ;;  %p1903_p7 = scmp.ne.s32.totalorder %s1902_s27, 0 }
  0x45   : > { %p1368_p10 = scmp.ne.s32.totalorder %s1641_s6, %s1367_s9  ;;  %s1372_s29 = scalar_lea.hbm %s1892_s2, 4096 }
  0x46   : > { %p1369_p8 = pneg %p1903_p7  ;;  %p1373_p1 = scmp.lt.u32.totalorder %s1641_s6, %s1892_s2 }
  0x47   : > { %p1374_p2 = scmp.lt.u32.totalorder %s1372_s29, %s1367_s9  ;;  %p1376_p5 = scmp.lt.u32.totalorder %s1367_s9, %s1641_s6 }
  0x48   : > { %p1370_p12 = pnand %p1369_p8, %p1368_p10 }
  0x49   : > { %p1375_p4 = por %p1374_p2, %p1373_p1 }
  0x4a   : > { %p1371_p13 = pneg %p1370_p12 }
  0x4b   : > { %p1377_p6 = por %p1376_p5, %p1375_p4 }
  0x4d   : > { %p1378_p9 = pnand %p1377_p6, %p1371_p13 }
  0x4f   : > { %1381 = shalt.err (!%p1378_p9)
}
  0x50   : > { %s1382_s13 = scalar_lea.vmem %s1646_s7, 1024  ;;  %s1491_s14 = smov [#allocation8]  }
  0x51   : > { %p1383_p11 = scmp.ne.s32.totalorder %s1646_s7, %s1382_s13  ;;  %s1387_s5 = sshll.u32 %s1491_s14, 4  ;;  %s1388_s5 = int_to_ptr.vmem [resolvable:$false] %s1387_s5 }
  0x52   : > { %s1389_s15 = scalar_lea.vmem %s1388_s5, 2048  ;;  %p1390_p10 = scmp.lt.s32.totalorder %s1646_s7, %s1388_s5 }
  0x53   : > { %p1385_p0 = pnand %p1383_p11, %p1369_p8  ;;  %p1391_p12 = scmp.lt.s32.totalorder %s1389_s15, %s1382_s13 }
  0x55   : > { %p1386_p3 = pneg %p1385_p0  ;;  %p1392_p1 = por %p1391_p12, %p1390_p10 }
  0x57   : > { %p1393_p2 = pnand %p1392_p1, %p1386_p3 }
  0x59   : > { %1396 = shalt.err (!%p1393_p2)
}
  0x5a   : > { %1192 = dma.hbm_to_vmem [thread:$0]  (!%p1903_p7), %s1641_s6, 1024, %s1646_s7, %s1648_s8, %s1488_s10, %s1488_s10, %s1489_s11  }
  0x5b   : > { %p1904_p8 = scmp.ne.s32.totalorder %s1900_s23, 0 }
  0x5c   : > { %p1905_p13 = scmp.eq.s32.totalorder (!%p1904_p8), %s1549_s21, 0 }
  0x5d   : > { %225 = sbr.rel (%p1904_p8) target bundleno = 677 (0x2a5), region = 36 }
  0x64   : > { %1448 = dma.done.wait (%p1905_p13), [#allocation4], 1024   ;;  %p1906_p4 = pmov %p1905_p13 }
  0x66   : > { %1450 = vsyncadd (%p1906_p4), [#allocation4], 4294966272  ;;  %p1907_p5 = pmov %p1906_p4 }
  0x67   : > { %p1908_p6 = pmov %p1906_p4 }
  0x68   : > { %1452 = dma.done.wait (%p1907_p5), [#allocation7], 1024  }
  0x69   : > { %1454 = vsyncadd (%p1908_p6), [#allocation7], 4294966272  ;;  %s235_s27 = sand.u32 1, %s1549_s21   ;;  %s237_s10 = sand.u32 1, %s1469_s16  }
  0x6a   : > { %s979_s11 = sshll.u32 %s237_s10, 6  ;;  %s236_s23 = scalar_lea.sflag [#allocation4], %s235_s27 }
  0x6b   : > { %s1691_s6 = scalar_lea.vmem [#allocation8], %s979_s11  ;;  %p1909_p7 = scmp.ne.s32.totalorder %s1899_s22, 0 }
  0x6d   : > { %1456 = dma.done.wait (%p1909_p7), %s236_s23, 1024  }
  0x6e   : > { %1458 = vsyncadd (%p1909_p7), %s236_s23, 4294966272  ;;  %p263_p9 = scmp.lt.s32.totalorder %s1477_s18, 3  ;;  %p267_p11 = scmp.eq.s32.totalorder %s1477_s18, 0 }
  0x6f   : > { %v1255_v0 = vld [vmem:[#allocation3] sm:$0xff] (%p267_p11)   ;;  %v1256_v1 = vld [vmem:[#allocation3 + $0x8] sm:$0xff] (%p267_p11)   ;;  %v1257_v2 = vld [vmem:[#allocation3 + $0x10] sm:$0xff] (%p267_p11)  }
  0x70   : > { %s1700_s7 = scalar_select %p263_p9, %s1477_s18, 3 }
  0x71   : > { %272 = sbr.rel (!%p267_p11) target bundleno = 120 (0x78), region = 52  ;;  %337 = vst [vmem:[#allocation2] sm:$0xff] (%p267_p11), %v1255_v0  ;;  %338 = vst [vmem:[#allocation2 + $0x8] sm:$0xff] (%p267_p11), %v1256_v1  ;;  %v1258_v3 = vld [vmem:[#allocation3 + $0x18] sm:$0xff] (%p267_p11)   ;;  %v1259_v4 = vld [vmem:[#allocation3 + $0x20] sm:$0xff] (%p267_p11)  }
  0x72   : > { %s265_s26 = scalar_lea.vmem %s1893_s3, %s1700_s7  ;;  %339 = vst [vmem:[#allocation2 + $0x10] sm:$0xff] (%p267_p11), %v1257_v2  ;;  %340 = vst [vmem:[#allocation2 + $0x18] sm:$0xff] (%p267_p11), %v1258_v3  ;;  %v1260_v5 = vld [vmem:[#allocation3 + $0x28] sm:$0xff] (%p267_p11)   ;;  %v1261_v6 = vld [vmem:[#allocation3 + $0x30] sm:$0xff] (%p267_p11)  }
  0x73   : > { %341 = vst [vmem:[#allocation2 + $0x20] sm:$0xff] (%p267_p11), %v1259_v4  ;;  %342 = vst [vmem:[#allocation2 + $0x28] sm:$0xff] (%p267_p11), %v1260_v5  ;;  %v1262_v7 = vld [vmem:[#allocation3 + $0x38] sm:$0xff] (%p267_p11)  }
  0x74   : > { %343 = vst [vmem:[#allocation2 + $0x30] sm:$0xff] (%p267_p11), %v1261_v6  ;;  %344 = vst [vmem:[#allocation2 + $0x38] sm:$0xff] (%p267_p11), %v1262_v7 }
  0x78 PF: > { %p345_p0 = scmp.lt.s32.totalorder %s1477_s18, 0  ;;  %s346_s22 = ssub.s32 0, %s1477_s18  ;;  %v1263_v8 = vld [vmem:[#allocation6] sm:$0xff]   ;;  %v1265_v18 = vld [vmem:[#allocation6 + $0x8] sm:$0xff]   ;;  %v1267_v20 = vld [vmem:[#allocation6 + $0x10] sm:$0xff]  }
  0x79   : > { %s989_s28 = smin.u32 %s1477_s18, %s346_s22  ;;  %v1264_v9 = vld [vmem:[#allocation6 + $0x20] sm:$0xff]   ;;  %1088 = vmatprep.mubr.bf16.mxu0 %v1263_v8  ;;  %v1266_v19 = vld [vmem:[#allocation6 + $0x28] sm:$0xff]   ;;  %v1268_v21 = vld [vmem:[#allocation6 + $0x30] sm:$0xff]   ;;  %p1003_p10 = scmp.ne.s32.totalorder %s1477_s18, 3 }
  0x7a   : > { %s348_s29 = sand.u32 1, %s989_s28   ;;  %1096 = vmatprep.mubr.bf16.mxu1 %v1264_v9  ;;  %v1269_v22 = vld [vmem:[#allocation6 + $0x18] sm:$0xff]   ;;  %v994_v24 = vld [vmem:[%s265_s26] ss:$0 sm:$0xff] }
  0x7b   : > { %s349_s24 = ssub.s32 0, %s348_s29  ;;  %v1270_v23 = vld [vmem:[#allocation6 + $0x38] sm:$0xff]  }
  0x7c   : > { %s1918_s24 = smov (!%p345_p0, %s349_s24), %s348_s29 }
  0x7d   : > { %p991_p3 = scmp.lt.s32.totalorder %s1918_s24, 0  ;;  %s355_s30 = sadd.s32 2, %s1918_s24 }
  0x7f   : > { %s1920_s30 = smov (!%p991_p3, %s355_s30), %s1918_s24 }
  0x80   : > { %s992_s13 = sshll.u32 %s1920_s30, 7 }
  0x81   : > { %s374_s14 = sshra.s32 %s992_s13, 4 }
  0x82   : > { %s993_s5 = sshll.u32 %s374_s14, 3 }
  0x83   : > { %s1709_s15 = scalar_lea.vmem [#allocation2], %s993_s5 }
  0x84   : > { %v378_v10 = vld [vmem:[%s1709_s15] sm:$0xff]  ;;  %v379_v11 = vld [vmem:[%s1709_s15 + $0x8] sm:$0xff]  ;;  %v380_v12 = vld [vmem:[%s1709_s15 + $0x10] sm:$0xff] }
  0x85   : > { %1072 = vmatprep.subr.bf16.mxu0 %v378_v10  ;;  %1136 = vmatprep.subr.bf16.mxu1 %v378_v10  ;;  %v381_v13 = vld [vmem:[%s1709_s15 + $0x18] sm:$0xff]  ;;  %v382_v14 = vld [vmem:[%s1709_s15 + $0x20] sm:$0xff]  ;;  %v383_v15 = vld [vmem:[%s1709_s15 + $0x28] sm:$0xff] }
  0x86   : > { %1073 = vmatpush3.bf16.msra.mxu0 %v378_v10  ;;  %1144 = vmatpush3.bf16.msra.mxu1 %v378_v10  ;;  %v384_v16 = vld [vmem:[%s1709_s15 + $0x30] sm:$0xff]  ;;  %v385_v17 = vld [vmem:[%s1709_s15 + $0x38] sm:$0xff] }
  0x87   : > { %1074 = vmatprep.subr.bf16.mxu0 %v379_v11  ;;  %1137 = vmatprep.subr.bf16.mxu1 %v379_v11 }
  0x8a   : > { %1075 = vmatpush3.bf16.msra.mxu0 %v379_v11  ;;  %1145 = vmatpush3.bf16.msra.mxu1 %v379_v11 }
  0x8b   : > { %1076 = vmatprep.subr.bf16.mxu0 %v380_v12  ;;  %1138 = vmatprep.subr.bf16.mxu1 %v380_v12 }
  0x8e   : > { %1077 = vmatpush3.bf16.msra.mxu0 %v380_v12  ;;  %1146 = vmatpush3.bf16.msra.mxu1 %v380_v12 }
  0x8f   : > { %1078 = vmatprep.subr.bf16.mxu0 %v381_v13  ;;  %1139 = vmatprep.subr.bf16.mxu1 %v381_v13 }
  0x92   : > { %1079 = vmatpush3.bf16.msra.mxu0 %v381_v13  ;;  %1147 = vmatpush3.bf16.msra.mxu1 %v381_v13 }
  0x93   : > { %1080 = vmatprep.subr.bf16.mxu0 %v382_v14  ;;  %1140 = vmatprep.subr.bf16.mxu1 %v382_v14 }
  0x96   : > { %1081 = vmatpush3.bf16.msra.mxu0 %v382_v14  ;;  %1148 = vmatpush3.bf16.msra.mxu1 %v382_v14 }
  0x97   : > { %1082 = vmatprep.subr.bf16.mxu0 %v383_v15  ;;  %1141 = vmatprep.subr.bf16.mxu1 %v383_v15 }
  0x9a   : > { %1083 = vmatpush3.bf16.msra.mxu0 %v383_v15  ;;  %1149 = vmatpush3.bf16.msra.mxu1 %v383_v15 }
  0x9b   : > { %1084 = vmatprep.subr.bf16.mxu0 %v384_v16  ;;  %1142 = vmatprep.subr.bf16.mxu1 %v384_v16 }
  0x9e   : > { %1085 = vmatpush3.bf16.msra.mxu0 %v384_v16  ;;  %1150 = vmatpush3.bf16.msra.mxu1 %v384_v16 }
  0x9f   : > { %1086 = vmatprep.subr.bf16.mxu0 %v385_v17  ;;  %1143 = vmatprep.subr.bf16.mxu1 %v385_v17 }
  0xa2   : > { %1087 = vmatpush3.bf16.msra.mxu0 %v385_v17  ;;  %1151 = vmatpush3.bf16.msra.mxu1 %v385_v17 }
  0xa5   : > { %1089 = vmatmul.mubr.bf16.vlgmr.msra.gmra.mrb[0].mxu0 %v1265_v18  ;;  %1097 = vmatmul.mubr.bf16.vlgmr.msra.gmra.mrb[0].mxu1 %v1266_v19 }
  0xa6   : > { %1092 = vmatprep.mubr.bf16.mxu0 %v1267_v20  ;;  %1100 = vmatprep.mubr.bf16.mxu1 %v1268_v21 }
  0xad   : > { %1093 = vmatmul.mubr.bf16.gmra.mrb[4].mxu0 %v1269_v22  ;;  %1101 = vmatmul.mubr.bf16.gmra.mrb[4].mxu1 %v1270_v23 }
 0x178   : > { %v1090_v25 = vpop.f32.mrb[0].mxu0  ;;  %v1098_v26 = vpop.f32.mrb[0].mxu1 }
 0x179   : > { %v1724_v27 = vadd.f32 %v1090_v25, %v994_v24  ;;  %v1726_v28 = vadd.f32 %v1098_v26, %v994_v24  ;;  %v475_v29 = vpop.f32.mrb[1].mxu0  ;;  %v507_v30 = vpop.f32.mrb[1].mxu1 }
 0x17a   : > { %v1728_v31 = vadd.f32 %v994_v24, %v475_v29  ;;  %v1730_v32 = vadd.f32 %v994_v24, %v507_v30  ;;  %v1091_v33 = vpop.f32.mrb[2].mxu0  ;;  %v1099_v34 = vpop.f32.mrb[2].mxu1 }
 0x17b   : > { %v1732_v35 = vadd.f32 %v1091_v33, %v994_v24  ;;  %v1734_v36 = vadd.f32 %v1099_v34, %v994_v24  ;;  %v478_v37 = vpop.f32.mrb[3].mxu0  ;;  %v510_v38 = vpop.f32.mrb[3].mxu1  ;;  %546 = vst [vmem:[#allocation9 + $0x10] sm:$0xff] (!%p1003_p10), %v1724_v27  ;;  %554 = vst [vmem:[#allocation9 + $0x50] sm:$0xff] (!%p1003_p10), %v1726_v28 }
 0x17c   : > { %v1736_v39 = vadd.f32 %v994_v24, %v478_v37  ;;  %v1738_v40 = vadd.f32 %v994_v24, %v510_v38  ;;  %544 = vst [vmem:[#allocation9] sm:$0xff] (!%p1003_p10), %v1728_v31  ;;  %552 = vst [vmem:[#allocation9 + $0x40] sm:$0xff] (!%p1003_p10), %v1730_v32 }
 0x17d   : > { %547 = vst [vmem:[#allocation9 + $0x18] sm:$0xff] (!%p1003_p10), %v1732_v35  ;;  %555 = vst [vmem:[#allocation9 + $0x58] sm:$0xff] (!%p1003_p10), %v1734_v36 }
 0x17e   : > { %542 = sbr.rel (%p1003_p10) target bundleno = 391 (0x187), region = 56  ;;  %545 = vst [vmem:[#allocation9 + $0x8] sm:$0xff] (!%p1003_p10), %v1736_v39  ;;  %553 = vst [vmem:[#allocation9 + $0x48] sm:$0xff] (!%p1003_p10), %v1738_v40 }
 0x180   : > { %v1094_v41 = vpop.f32.mrb[4].mxu0  ;;  %v1102_v42 = vpop.f32.mrb[4].mxu1 }
 0x181   : > { %v1740_v43 = vadd.f32 %v1094_v41, %v994_v24  ;;  %v1742_v44 = vadd.f32 %v1102_v42, %v994_v24  ;;  %v491_v45 = vpop.f32.mrb[5].mxu0  ;;  %v523_v46 = vpop.f32.mrb[5].mxu1 }
 0x182   : > { %v1744_v47 = vadd.f32 %v994_v24, %v491_v45  ;;  %v1746_v48 = vadd.f32 %v994_v24, %v523_v46  ;;  %v1095_v49 = vpop.f32.mrb[6].mxu0  ;;  %v1103_v50 = vpop.f32.mrb[6].mxu1 }
 0x183   : > { %v1748_v51 = vadd.f32 %v1095_v49, %v994_v24  ;;  %v1750_v52 = vadd.f32 %v1103_v50, %v994_v24  ;;  %v494_v53 = vpop.f32.mrb[7].mxu0  ;;  %v526_v54 = vpop.f32.mrb[7].mxu1  ;;  %550 = vst [vmem:[#allocation9 + $0x30] sm:$0xff] (!%p1003_p10), %v1740_v43  ;;  %558 = vst [vmem:[#allocation9 + $0x70] sm:$0xff] (!%p1003_p10), %v1742_v44 }
 0x184   : > { %v1752_v55 = vadd.f32 %v994_v24, %v494_v53  ;;  %v1754_v56 = vadd.f32 %v994_v24, %v526_v54  ;;  %548 = vst [vmem:[#allocation9 + $0x20] sm:$0xff] (!%p1003_p10), %v1744_v47  ;;  %556 = vst [vmem:[#allocation9 + $0x60] sm:$0xff] (!%p1003_p10), %v1746_v48 }
 0x185   : > { %551 = vst [vmem:[#allocation9 + $0x38] sm:$0xff] %v1748_v51  ;;  %559 = vst [vmem:[#allocation9 + $0x78] sm:$0xff] %v1750_v52 }
 0x186   : > { %549 = vst [vmem:[#allocation9 + $0x28] sm:$0xff] %v1752_v55  ;;  %557 = vst [vmem:[#allocation9 + $0x68] sm:$0xff] %v1754_v56 }
 0x187 PF: > { %p1004_p12 = scmp.eq.s32.totalorder %s1477_s18, 3 }
 0x188   : > { %v1271_v57 = vld [vmem:[%s1691_s6] sm:$0xff] (!%p1004_p12)   ;;  %v1272_v58 = vld [vmem:[%s1691_s6 + $0x8] sm:$0xff] (!%p1004_p12)   ;;  %v1273_v59 = vld [vmem:[%s1691_s6 + $0x10] sm:$0xff] (!%p1004_p12)   ;;  %v580_v60 = vmin.f32 (!%p1004_p12), %v1728_v31, 0.0  ;;  %v581_v61 = vmin.f32 (!%p1004_p12), %v1736_v39, 0.0  ;;  %v588_v62 = vmin.f32 (!%p1004_p12), %v1730_v32, 0.0 }
 0x189   : > { %563 = sbr.rel (%p1004_p12) target bundleno = 651 (0x28b), region = 60  ;;  %1104 = vmatprep.subr.bf16.mxu0 (!%p1004_p12), %v1271_v57  ;;  %1152 = vmatprep.subr.bf16.mxu1 (!%p1004_p12), %v1271_v57  ;;  %v1274_v63 = vld [vmem:[%s1691_s6 + $0x18] sm:$0xff] (!%p1004_p12)   ;;  %v589_v0 = vmin.f32 (!%p1004_p12), %v1738_v40, 0.0  ;;  %v582_v5 = vmin.f32 (!%p1004_p12), %v1724_v27, 0.0  ;;  %v583_v6 = vmin.f32 (!%p1004_p12), %v1732_v35, 0.0  ;;  %v590_v8 = vmin.f32 (!%p1004_p12), %v1726_v28, 0.0 }
 0x18a   : > { %1105 = vmatpush3.bf16.msra.mxu0 (!%p1004_p12), %v1271_v57  ;;  %1160 = vmatpush3.bf16.msra.mxu1 (!%p1004_p12), %v1271_v57  ;;  %v596_v1 = vmul.f32 (!%p1004_p12), 1.442695, %v580_v60  ;;  %v598_v2 = vmul.f32 (!%p1004_p12), 1.442695, %v581_v61  ;;  %v612_v3 = vmul.f32 (!%p1004_p12), 1.442695, %v588_v62 }
 0x18b   : > { %1106 = vmatprep.subr.bf16.mxu0 (!%p1004_p12), %v1272_v58  ;;  %1153 = vmatprep.subr.bf16.mxu1 (!%p1004_p12), %v1272_v58  ;;  %v614_v4 = vmul.f32 (!%p1004_p12), 1.442695, %v589_v0  ;;  %v600_v7 = vmul.f32 (!%p1004_p12), 1.442695, %v582_v5  ;;  %v591_v9 = vmin.f32 (!%p1004_p12), %v1734_v36, 0.0  ;;  %v1275_v10 = vld [vmem:[%s1691_s6 + $0x20] sm:$0xff] (!%p1004_p12)  }
 0x18c   : > { %1279 = vpow2.f32 (!%p1004_p12), %v596_v1  ;;  %v602_v11 = vmul.f32 (!%p1004_p12), 1.442695, %v583_v6  ;;  %v616_v12 = vmul.f32 (!%p1004_p12), 1.442695, %v590_v8  ;;  %v584_v14 = vmin.f32 (!%p1004_p12), %v1744_v47, 0.0  ;;  %v1276_v19 = vld [vmem:[%s1691_s6 + $0x28] sm:$0xff] (!%p1004_p12)  }
 0x18d   : > { %1281 = vpow2.f32 (!%p1004_p12), %v598_v2  ;;  %v618_v13 = vmul.f32 (!%p1004_p12), 1.442695, %v591_v9  ;;  %v585_v15 = vmin.f32 (!%p1004_p12), %v1752_v55, 0.0  ;;  %v592_v17 = vmin.f32 (!%p1004_p12), %v1746_v48, 0.0  ;;  %v1277_v33 = vld [vmem:[%s1691_s6 + $0x30] sm:$0xff] (!%p1004_p12)   ;;  %v1278_v57 = vld [vmem:[%s1691_s6 + $0x38] sm:$0xff] (!%p1004_p12)  }
 0x18e   : > { %1107 = vmatpush3.bf16.msra.mxu0 (!%p1004_p12), %v1272_v58  ;;  %1161 = vmatpush3.bf16.msra.mxu1 (!%p1004_p12), %v1272_v58  ;;  %1283 = vpow2.f32 (!%p1004_p12), %v612_v3  ;;  %v604_v16 = vmul.f32 (!%p1004_p12), 1.442695, %v584_v14  ;;  %v593_v18 = vmin.f32 (!%p1004_p12), %v1754_v56, 0.0  ;;  %v586_v23 = vmin.f32 (!%p1004_p12), %v1740_v43, 0.0  ;;  %s660_s11 = sadd.s32 (!%p1004_p12), 1, %s1477_s18 }
 0x18f   : > { %1108 = vmatprep.subr.bf16.mxu0 (!%p1004_p12), %v1273_v59  ;;  %1154 = vmatprep.subr.bf16.mxu1 (!%p1004_p12), %v1273_v59  ;;  %1285 = vpow2.f32 (!%p1004_p12), %v614_v4  ;;  %v606_v20 = vmul.f32 (!%p1004_p12), 1.442695, %v585_v15  ;;  %v620_v21 = vmul.f32 (!%p1004_p12), 1.442695, %v592_v17  ;;  %v587_v24 = vmin.f32 (!%p1004_p12), %v1748_v51, 0.0  ;;  %s662_s23 = ssub.s32 (!%p1004_p12), 0, %s660_s11 }
 0x190   : > { %1287 = vpow2.f32 %v600_v7  ;;  %v622_v22 = vmul.f32 1.442695, %v593_v18  ;;  %v608_v25 = vmul.f32 1.442695, %v586_v23  ;;  %v594_v26 = vmin.f32 %v1742_v44, 0.0  ;;  %s1021_s6 = smin.u32 %s662_s23, %s660_s11  ;;  %p661_p1 = scmp.lt.s32.totalorder %s660_s11, 0 }
 0x191   : > { %1289 = vpow2.f32 %v602_v11  ;;  %v595_v29 = vmin.f32 %v1750_v52, 0.0  ;;  %vm564_vm0 = vcmp.gt.f32.partialorder %v1728_v31, 0.0  ;;  %vm565_vm1 = vcmp.gt.f32.partialorder %v1736_v39, 0.0  ;;  %s664_s7 = sand.u32 1, %s1021_s6  }
 0x192   : > { %1109 = vmatpush3.bf16.msra.mxu0 %v1273_v59  ;;  %1162 = vmatpush3.bf16.msra.mxu1 %v1273_v59  ;;  %1291 = vpow2.f32 %v616_v12  ;;  %v610_v34 = vmul.f32 1.442695, %v587_v24  ;;  %v624_v41 = vmul.f32 1.442695, %v594_v26  ;;  %vm572_vm2 = vcmp.gt.f32.partialorder %v1730_v32, 0.0  ;;  %s665_s8 = ssub.s32 0, %s664_s7 }
 0x193   : > { %1110 = vmatprep.subr.bf16.mxu0 %v1274_v63  ;;  %1155 = vmatprep.subr.bf16.mxu1 %v1274_v63  ;;  %1293 = vpow2.f32 %v618_v13  ;;  %v626_v42 = vmul.f32 1.442695, %v595_v29  ;;  %vm573_vm3 = vcmp.gt.f32.partialorder %v1738_v40, 0.0  ;;  %vm566_vm4 = vcmp.gt.f32.partialorder %v1724_v27, 0.0  ;;  %s1922_s8 = smov (!%p661_p1, %s665_s8), %s664_s7 }
 0x194   : > { %1295 = vpow2.f32 %v604_v16  ;;  %vm567_vm5 = vcmp.gt.f32.partialorder %v1732_v35, 0.0  ;;  %vm574_vm6 = vcmp.gt.f32.partialorder %v1726_v28, 0.0  ;;  %vm575_vm7 = vcmp.gt.f32.partialorder %v1734_v36, 0.0  ;;  %p1023_p2 = scmp.lt.s32.totalorder %s1922_s8, 0  ;;  %s671_s9 = sadd.s32 2, %s1922_s8 }
 0x195   : > { %1297 = vpow2.f32 %v606_v20  ;;  %vm568_vm8 = vcmp.gt.f32.partialorder %v1744_v47, 0.0  ;;  %vm569_vm9 = vcmp.gt.f32.partialorder %v1752_v55, 0.0  ;;  %vm576_vm10 = vcmp.gt.f32.partialorder %v1746_v48, 0.0 }
 0x196   : > { %1111 = vmatpush3.bf16.msra.mxu0 %v1274_v63  ;;  %1163 = vmatpush3.bf16.msra.mxu1 %v1274_v63  ;;  %v1280_v30 = vpop.eup %1279  ;;  %1299 = vpow2.f32 %v620_v21  ;;  %vm577_vm11 = vcmp.gt.f32.partialorder %v1754_v56, 0.0  ;;  %vm570_vm12 = vcmp.gt.f32.partialorder %v1740_v43, 0.0  ;;  %vm571_vm13 = vcmp.gt.f32.partialorder %v1748_v51, 0.0  ;;  %s1924_s9 = smov (!%p1023_p2, %s671_s9), %s1922_s8 }
 0x197   : > { %1112 = vmatprep.subr.bf16.mxu0 %v1275_v10  ;;  %1156 = vmatprep.subr.bf16.mxu1 %v1275_v10  ;;  %v1282_v37 = vpop.eup %1281  ;;  %v1005_v38 = vadd.f32 -1.0, %v1280_v30  ;;  %1301 = vpow2.f32 %v622_v22  ;;  %vm578_vm14 = vcmp.gt.f32.partialorder %v1742_v44, 0.0  ;;  %vm579_vm15 = vcmp.gt.f32.partialorder %v1750_v52, 0.0  ;;  %s1024_s26 = sshll.u32 %s1924_s9, 7 }
 0x198   : > { %v1284_v45 = vpop.eup %1283  ;;  %v1006_v46 = vadd.f32 -1.0, %v1282_v37  ;;  %1303 = vpow2.f32 %v608_v25  ;;  %s852_s22 = sshra.s32 %s1024_s26, 4 }
 0x199   : > { %v1286_v49 = vpop.eup %1285  ;;  %v644_v50 = vsel %vm564_vm0, %v1728_v31, %v1005_v38  ;;  %v1013_v53 = vadd.f32 -1.0, %v1284_v45  ;;  %1305 = vpow2.f32 %v610_v34  ;;  %s1033_s28 = sshll.u32 %s852_s22, 3 }
 0x19a   : > { %1113 = vmatpush3.bf16.msra.mxu0 %v1275_v10  ;;  %1164 = vmatpush3.bf16.msra.mxu1 %v1275_v10  ;;  %v1288_v54 = vpop.eup %1287  ;;  %v645_v58 = vsel %vm565_vm1, %v1736_v39, %v1006_v46  ;;  %v1014_v59 = vadd.f32 -1.0, %v1286_v49  ;;  %1307 = vpow2.f32 %v624_v41  ;;  %s855_s18 = scalar_lea.vmem [#allocation2], %s1033_s28 }
 0x19b   : > { %1114 = vmatprep.subr.bf16.mxu0 %v1276_v19  ;;  %1157 = vmatprep.subr.bf16.mxu1 %v1276_v19  ;;  %v1290_v60 = vpop.eup %1289  ;;  %v675_v61 = vpack.c.bf16 %v645_v58, %v644_v50  ;;  %v652_v31 = vsel %vm572_vm2, %v1730_v32, %v1013_v53  ;;  %v1007_v62 = vadd.f32 -1.0, %v1288_v54  ;;  %1309 = vpow2.f32 %v626_v42 }
 0x19c   : > { %v1292_v63 = vpop.eup %1291  ;;  %v653_v0 = vsel %vm573_vm3, %v1738_v40, %v1014_v59  ;;  %v1008_v1 = vadd.f32 -1.0, %v1290_v60 }
 0x19d   : > { %v1294_v39 = vpop.eup %1293  ;;  %v679_v2 = vpack.c.bf16 %v653_v0, %v652_v31  ;;  %v646_v3 = vsel %vm566_vm4, %v1724_v27, %v1007_v62  ;;  %v1015_v32 = vadd.f32 -1.0, %v1292_v63  ;;  %1120 = vmatprep.mubr.bf16.mxu0 %v675_v61 }
 0x19e   : > { %1115 = vmatpush3.bf16.msra.mxu0 %v1276_v19  ;;  %1165 = vmatpush3.bf16.msra.mxu1 %v1276_v19  ;;  %v1296_v4 = vpop.eup %1295  ;;  %v647_v40 = vsel %vm567_vm5, %v1732_v35, %v1008_v1  ;;  %v1016_v5 = vadd.f32 -1.0, %v1294_v39 }
 0x19f   : > { %1116 = vmatprep.subr.bf16.mxu0 %v1277_v33  ;;  %1158 = vmatprep.subr.bf16.mxu1 %v1277_v33  ;;  %v1298_v6 = vpop.eup %1297  ;;  %v654_v27 = vsel %vm574_vm6, %v1726_v28, %v1015_v32  ;;  %v1009_v7 = vadd.f32 -1.0, %v1296_v4  ;;  %v676_v9 = vpack.c.bf16 %v647_v40, %v646_v3 }
 0x1a0   : > { %1128 = vmatprep.mubr.bf16.mxu1 %v679_v2  ;;  %v1300_v8 = vpop.eup %1299  ;;  %v655_v10 = vsel %vm575_vm7, %v1734_v36, %v1016_v5  ;;  %v1010_v35 = vadd.f32 -1.0, %v1298_v6 }
 0x1a1   : > { %v1302_v11 = vpop.eup %1301  ;;  %v680_v12 = vpack.c.bf16 %v655_v10, %v654_v27  ;;  %v648_v28 = vsel %vm568_vm8, %v1744_v47, %v1009_v7  ;;  %v1017_v13 = vadd.f32 -1.0, %v1300_v8 }
 0x1a2   : > { %1117 = vmatpush3.bf16.msra.mxu0 %v1277_v33  ;;  %1166 = vmatpush3.bf16.msra.mxu1 %v1277_v33  ;;  %v1304_v14 = vpop.eup %1303  ;;  %v649_v15 = vsel %vm569_vm9, %v1752_v55, %v1010_v35  ;;  %v1018_v16 = vadd.f32 -1.0, %v1302_v11 }
 0x1a3   : > { %1118 = vmatprep.subr.bf16.mxu0 %v1278_v57  ;;  %1159 = vmatprep.subr.bf16.mxu1 %v1278_v57  ;;  %v1306_v36 = vpop.eup %1305  ;;  %v677_v17 = vpack.c.bf16 %v649_v15, %v648_v28  ;;  %v656_v18 = vsel %vm576_vm10, %v1746_v48, %v1017_v13  ;;  %v1011_v19 = vadd.f32 -1.0, %v1304_v14 }
 0x1a4   : > { %v1308_v20 = vpop.eup %1307  ;;  %v657_v47 = vsel %vm577_vm11, %v1754_v56, %v1018_v16  ;;  %v1012_v21 = vadd.f32 -1.0, %v1306_v36 }
 0x1a5   : > { %v1310_v55 = vpop.eup %1309  ;;  %v681_v22 = vpack.c.bf16 %v657_v47, %v656_v18  ;;  %v650_v23 = vsel %vm570_vm12, %v1740_v43, %v1011_v19  ;;  %v1019_v48 = vadd.f32 -1.0, %v1308_v20 }
 0x1a6   : > { %1119 = vmatpush3.bf16.msra.mxu0 %v1278_v57  ;;  %1167 = vmatpush3.bf16.msra.mxu1 %v1278_v57  ;;  %v651_v24 = vsel %vm571_vm13, %v1748_v51, %v1012_v21  ;;  %v1020_v25 = vadd.f32 -1.0, %v1310_v55 }
 0x1a7   : > { %v658_v26 = vsel %vm578_vm14, %v1742_v44, %v1019_v48  ;;  %v678_v29 = vpack.c.bf16 %v651_v24, %v650_v23 }
 0x1a8   : > { %v659_v56 = vsel %vm579_vm15, %v1750_v52, %v1020_v25 }
 0x1a9   : > { %1121 = vmatmul.mubr.bf16.vlgmr.msra.gmra.mrb[0].mxu0 %v676_v9  ;;  %1129 = vmatmul.mubr.bf16.vlgmr.msra.gmra.mrb[0].mxu1 %v680_v12  ;;  %v682_v30 = vpack.c.bf16 %v659_v56, %v658_v26 }
 0x1aa   : > { %1124 = vmatprep.mubr.bf16.mxu0 %v677_v17  ;;  %1132 = vmatprep.mubr.bf16.mxu1 %v681_v22 }
 0x1b1   : > { %1125 = vmatmul.mubr.bf16.gmra.mrb[4].mxu0 %v678_v29  ;;  %1133 = vmatmul.mubr.bf16.gmra.mrb[4].mxu1 %v682_v30 }
 0x27c   : > { %v1122_v43 = vpop.f32.mrb[0].mxu0  ;;  %v1130_v44 = vpop.f32.mrb[0].mxu1 }
 0x27d   : > { %v781_v51 = vpop.f32.mrb[1].mxu0  ;;  %v813_v52 = vpop.f32.mrb[1].mxu1 }
 0x27e   : > { %v1123_v33 = vpop.f32.mrb[2].mxu0  ;;  %v1131_v34 = vpop.f32.mrb[2].mxu1 }
 0x27f   : > { %v845_v37 = vpack.c.bf16 %v1123_v33, %v1122_v43  ;;  %v849_v38 = vpack.c.bf16 %v1131_v34, %v1130_v44  ;;  %v784_v41 = vpop.f32.mrb[3].mxu0  ;;  %v816_v42 = vpop.f32.mrb[3].mxu1 }
 0x280   : > { %v844_v45 = vpack.c.bf16 %v784_v41, %v781_v51  ;;  %v848_v46 = vpack.c.bf16 %v816_v42, %v813_v52 }
 0x281   : > { %857 = vst [vmem:[%s855_s18 + $0x8] sm:$0xff] %v845_v37  ;;  %861 = vst [vmem:[%s855_s18 + $0x28] sm:$0xff] %v849_v38 }
 0x282   : > { %856 = vst [vmem:[%s855_s18] sm:$0xff] %v844_v45  ;;  %860 = vst [vmem:[%s855_s18 + $0x20] sm:$0xff] %v848_v46 }
 0x284   : > { %v1126_v49 = vpop.f32.mrb[4].mxu0  ;;  %v1134_v50 = vpop.f32.mrb[4].mxu1 }
 0x285   : > { %v797_v53 = vpop.f32.mrb[5].mxu0  ;;  %v829_v54 = vpop.f32.mrb[5].mxu1 }
 0x286   : > { %v1127_v57 = vpop.f32.mrb[6].mxu0  ;;  %v1135_v58 = vpop.f32.mrb[6].mxu1 }
 0x287   : > { %v847_v59 = vpack.c.bf16 %v1127_v57, %v1126_v49  ;;  %v851_v60 = vpack.c.bf16 %v1135_v58, %v1134_v50  ;;  %v800_v61 = vpop.f32.mrb[7].mxu0  ;;  %v832_v31 = vpop.f32.mrb[7].mxu1 }
 0x288   : > { %v846_v62 = vpack.c.bf16 %v800_v61, %v797_v53  ;;  %v850_v63 = vpack.c.bf16 %v832_v31, %v829_v54 }
 0x289   : > { %859 = vst [vmem:[%s855_s18 + $0x18] sm:$0xff] %v847_v59  ;;  %863 = vst [vmem:[%s855_s18 + $0x38] sm:$0xff] %v851_v60 }
 0x28a   : > { %858 = vst [vmem:[%s855_s18 + $0x10] sm:$0xff] %v846_v62  ;;  %862 = vst [vmem:[%s855_s18 + $0x30] sm:$0xff] %v850_v63 }
 0x28b PF: > { %p1198_p8 = scmp.eq.s32.totalorder %s1549_s21, 3  ;;  %s1492_s29 = smov [#allocation9]  }
 0x28c   : > { %s870_s24 = sshll.u32 %s1492_s29, 4  ;;  %s871_s24 = int_to_ptr.vmem [resolvable:$true] %s870_s24 }
 0x28d   : > { %s1397_s30 = scalar_lea.vmem %s871_s24, 2048  ;;  %p1404_p6 = scmp.lt.s32.totalorder %s871_s24, %s871_s24 }
 0x28e   : > { %p1398_p13 = scmp.ne.s32.totalorder %s871_s24, %s1397_s30  ;;  %p1405_p7 = scmp.lt.s32.totalorder %s1397_s30, %s1397_s30 }
 0x290   : > { %p1399_p4 = pnand %p1398_p13, %p1198_p8  ;;  %p1406_p9 = por %p1405_p7, %p1404_p6 }
 0x292   : > { %p1400_p5 = pneg %p1399_p4 }
 0x294   : > { %p1407_p11 = pnand %p1406_p9, %p1400_p5 }
 0x296   : > { %1410 = shalt.err (!%p1407_p11)
}
 0x297   : > { %s1411_s5 = scalar_lea.hbm %s1894_s4, 2048 }
 0x298   : > { %p1412_p0 = scmp.ne.s32.totalorder %s1894_s4, %s1411_s5  ;;  %p1417_p12 = scmp.lt.u32.totalorder %s1411_s5, %s1894_s4 }
 0x29a   : > { %p1413_p3 = pnand %p1412_p0, %p1198_p8 }
 0x29c   : > { %p1414_p10 = pneg %p1413_p3 }
 0x29e   : > { %p1419_p1 = pnand %p1417_p12, %p1414_p10 }
 0x2a0   : > { %1422 = shalt.err (!%p1419_p1)
}
 0x2a1   : > { %s1493_s23 = smov 128   ;;  %s1494_s6 = smov 8  }
 0x2a2   : > { %1179 = dma.vmem_to_hbm [thread:$0]  (%p1198_p8), %s871_s24, 2048, %s1894_s4, [#allocation5], %s1493_s23, %s1493_s23, %s1494_s6  }
 0x2a3   : > { %1460 = dma.done.wait (%p1198_p8), [#allocation5], 2048  }
 0x2a4   : > { %1462 = vsyncadd (%p1198_p8), [#allocation5], 4294965248 }
 0x2a5 PF: > { %s17_s20 = sadd.s32 1, %s1485_s20   ;;  %s1910_s15 = smov %s1469_s16 }
 0x2a6   : > { %p14_p2 = scmp.ge.s32.totalorder %s17_s20, 6   ;;  %s1911_s16 = smov %s1473_s17 }
 0x2a7   : > { %s1912_s17 = smov %s1644_s25  ;;  %s1913_s18 = smov %s1481_s19 }
 0x2a8   : > { %s1914_s19 = smov %s1916_s12  ;;  %16 = sbr.rel (!%p14_p2) target bundleno = 5 (0x5), region = 99 }
 0x2af   :  { %886 = vsyncpa [#allocation4], 1 }
 0x2b0   :  { %888 = vsyncpa [#allocation4 + $0x1], 1 }
 0x2b1   :  { %889 = vsyncpa [#allocation7], 1 }
 0x2b2   :  { %890 = vsyncpa [#allocation5], 1 }
 0x2b3   :  { %892 = vsyncpa [#allocation5 + $0x1], 1 }

</bundles_post_ra>
